<compile_context>
chip_gen: v6e
topology: v6e:2x2x1
jax: 0.10.0
libtpu: 0.0.40
codegen_flags: <defaults>
</compile_context>

<pallas_src>
import math

import jax
import jax.numpy as jnp
from jax.experimental import pallas as pl
from jax.experimental.pallas import tpu as pltpu


# --------------------------------------------------------------------------
# Helpers
# --------------------------------------------------------------------------
def _cdiv(a, b):
    return -(-a // b)


def _round_up(x, m):
    return ((x + m - 1) // m) * m


def _gelu_tanh(x):
    # tanh-approximate GELU, factored to save one VPU multiply (v5e VALU).
    # TODO(synk): PyTorch nn.GELU() default is the exact erf form; the tanh
    # approximation differs by <~3e-3 (the reference path uses the same form).
    c = math.sqrt(2.0 / math.pi)
    return 0.5 * x * (1.0 + jnp.tanh(c * x * (1.0 + 0.044715 * x * x)))


def _vmem_budget_bytes():
    """Per-chip-safe VMEM budget for this kernel (leaves headroom)."""
    try:
        cap = pltpu.get_tpu_info().vmem_capacity_bytes
    except Exception:
        cap = 64 << 20                       # conservative (v7x-sized) default
    # ~48 MiB on v7x (64 MiB physical), capped at 100 MiB on 128 MiB chips.
    return min(int(cap * 3 // 4), 100 << 20)


# --------------------------------------------------------------------------
# Kernels
# --------------------------------------------------------------------------
def _mlp_kernel_resident(x_ref, w1_ref, b1_ref, w2_ref, b2_ref, o_ref):
    # In-kernel bf16 cast of the x tile (avoids a separate HBM pass over x).
    x = x_ref[...].astype(w1_ref.dtype)
    h = jnp.dot(x, w1_ref[...], preferred_element_type=jnp.float32)
    h = _gelu_tanh(h + b1_ref[...])
    o = jnp.dot(h.astype(w2_ref.dtype), w2_ref[...],
                preferred_element_type=jnp.float32)
    o_ref[...] = (o + b2_ref[...]).astype(o_ref.dtype)


def _mlp_kernel_hf_tiled(x_ref, w1_ref, b1_ref, w2_ref, b2_ref, o_ref, acc_ref):
    j = pl.program_id(1)

    @pl.when(j == 0)
    def _():
        acc_ref[...] = jnp.zeros_like(acc_ref)

    x = x_ref[...].astype(w1_ref.dtype)
    h = jnp.dot(x, w1_ref[...], preferred_element_type=jnp.float32)
    h = _gelu_tanh(h + b1_ref[...])
    acc_ref[...] += jnp.dot(h.astype(w2_ref.dtype), w2_ref[...],
                            preferred_element_type=jnp.float32)

    @pl.when(j == pl.num_programs(1) - 1)
    def _():
        o_ref[...] = (acc_ref[...] + b2_ref[...]).astype(o_ref.dtype)


# --------------------------------------------------------------------------
# Host-side wrapper
# --------------------------------------------------------------------------
def prepare_mlp_params(w1, b1, w2, b2, compute_dtype=jnp.bfloat16):
    """One-time conversion: hoists the per-call weight casts out of forward."""
    return (w1.astype(compute_dtype), b1.astype(jnp.float32),
            w2.astype(compute_dtype), b2.astype(jnp.float32))


def pallas_mlp(x2d, w1, b1, w2, b2, *, max_rows_per_step=1024,
               force_hf_tile=False, hf_tile_cap=2048):
    """x2d: (M, C); w1: (C, Hf); b1: (Hf,); w2: (Hf, D); b2: (D,) -> (M, D)."""
    M, C = x2d.shape
    Hf = w1.shape[1]
    D = w2.shape[1]
    compute_dtype = jnp.bfloat16

    # Weights should already be bf16 (prepare_mlp_params); cast defensively.
    w1c = w1 if w1.dtype == compute_dtype else w1.astype(compute_dtype)
    w2c = w2 if w2.dtype == compute_dtype else w2.astype(compute_dtype)
    b1c = b1.reshape(1, Hf).astype(jnp.float32)
    b2c = b2.reshape(1, D).astype(jnp.float32)

    out_dtype = jnp.float32
    x_bytes = x2d.dtype.itemsize
    budget = _vmem_budget_bytes()

    # ---- variant selection: whole-weight-resident vs Hf-tiled ---------------
    w_resident_bytes = (C * Hf + Hf * D) * 2 + (Hf + D) * 4
    hf_divisors = [t for t in range(128, Hf + 1, 128) if Hf % t == 0]
    use_resident = (not force_hf_tile) and (
        w_resident_bytes <= budget // 2 or not hf_divisors)

    # ---- row-tile choice (multiple of 16 for bf16 sublane packing) ----------
    def _pick_tm(avail_bytes, per_row_bytes):
        tm_cap = max_rows_per_step
        if M >= 256:
            # >= 2 row-tile steps so both v7x TensorCores get work.
            tm_cap = min(tm_cap, _round_up(_cdiv(M, 2), 16))
        tm_fit = max(16, (avail_bytes // max(per_row_bytes, 1)) // 16 * 16)
        tm = max(16, min(tm_cap, tm_fit))
        if tm >= M:
            tm = _round_up(M, 16)
        return tm

    if use_resident:
        # per-row VMEM: x tile (2 bufs) + out tile (2 bufs) + hidden f32 + bf16.
        per_row = 2 * C * x_bytes + 2 * D * 4 + Hf * (4 + 2)
        tm = _pick_tm(budget - w_resident_bytes, per_row)
        est = w_resident_bytes + tm * per_row
        vmem_limit = int(min(budget, max(est * 3 // 2, 16 << 20)))
        grid = (_cdiv(M, tm),)

        def _run(single_buffer_weights):
            const_kw = ({"pipeline_mode": pl.Buffered(1)}
                        if single_buffer_weights else {})
            return pl.pallas_call(
                _mlp_kernel_resident,
                out_shape=jax.ShapeDtypeStruct((M, D), out_dtype),
                grid_spec=pltpu.PrefetchScalarGridSpec(
                    num_scalar_prefetch=0,
                    grid=grid,
                    in_specs=[
                        pl.BlockSpec((tm, C), lambda i: (i, 0)),
                        pl.BlockSpec((C, Hf), lambda i: (0, 0), **const_kw),
                        pl.BlockSpec((1, Hf), lambda i: (0, 0), **const_kw),
                        pl.BlockSpec((Hf, D), lambda i: (0, 0), **const_kw),
                        pl.BlockSpec((1, D), lambda i: (0, 0), **const_kw),
                    ],
                    out_specs=pl.BlockSpec((tm, D), lambda i: (i, 0)),
                ),
                compiler_params=pltpu.CompilerParams(
                    dimension_semantics=("parallel",),
                    vmem_limit_bytes=vmem_limit,
                ),
            )(x2d, w1c, b1c, w2c, b2c)
    else:
        # Largest multiple-of-128 divisor of Hf whose double-buffered weight
        # tiles stay within ~1/3 of the budget (bounds both the weight slab
        # and the (tm, t_hf) hidden intermediate).
        t_hf = hf_divisors[0]
        for cand in hf_divisors:
            if cand <= hf_tile_cap and 2 * (C + D) * cand * 2 <= budget // 3:
                t_hf = cand
        w_tile_bytes = 2 * ((C + D) * t_hf * 2 + t_hf * 4) + D * 4
        per_row = 2 * C * x_bytes + 2 * D * 4 + D * 4 + t_hf * (4 + 2)
        tm = _pick_tm(budget - w_tile_bytes, per_row)
        est = w_tile_bytes + tm * per_row
        vmem_limit = int(min(budget, max(est * 3 // 2, 16 << 20)))
        grid = (_cdiv(M, tm), Hf // t_hf)

        def _run(single_buffer_weights):
            const_kw = ({"pipeline_mode": pl.Buffered(1)}
                        if single_buffer_weights else {})
            return pl.pallas_call(
                _mlp_kernel_hf_tiled,
                out_shape=jax.ShapeDtypeStruct((M, D), out_dtype),
                grid_spec=pltpu.PrefetchScalarGridSpec(
                    num_scalar_prefetch=0,
                    grid=grid,
                    in_specs=[
                        pl.BlockSpec((tm, C), lambda i, j: (i, 0)),
                        pl.BlockSpec((C, t_hf), lambda i, j: (0, j)),
                        pl.BlockSpec((1, t_hf), lambda i, j: (0, j)),
                        pl.BlockSpec((t_hf, D), lambda i, j: (j, 0)),
                        pl.BlockSpec((1, D), lambda i, j: (0, 0), **const_kw),
                    ],
                    out_specs=pl.BlockSpec((tm, D), lambda i, j: (i, 0)),
                    scratch_shapes=[pltpu.VMEM((tm, D), jnp.float32)],
                ),
                compiler_params=pltpu.CompilerParams(
                    dimension_semantics=("parallel", "arbitrary"),
                    vmem_limit_bytes=vmem_limit,
                ),
            )(x2d, w1c, b1c, w2c, b2c)

    try:
        return _run(single_buffer_weights=True)
    except Exception:
        # Fallback if this runtime rejects single-buffered constant blocks.
        return _run(single_buffer_weights=False)


def mlp_forward(x, H, W, params, use_pallas=True, **pallas_kwargs):
    """x: (B, N, in_features). H, W are unused by the module (API parity).

    Dropout is the identity here (p=0.0 default / eval mode).
    """
    del H, W
    B, N, C = x.shape
    w1, b1, w2, b2 = params
    x2d = x.reshape(B * N, C)
    if use_pallas:
        out2d = pallas_mlp(x2d, w1, b1, w2, b2, **pallas_kwargs)
    else:
        # Pure-JAX reference with identical casts (bf16 feed, f32 acc).
        xc = x2d.astype(jnp.bfloat16)
        h = jnp.dot(xc, w1.astype(jnp.bfloat16),
                    preferred_element_type=jnp.float32) + b1.astype(jnp.float32)
        h = _gelu_tanh(h)
        out2d = (jnp.dot(h.astype(jnp.bfloat16), w2.astype(jnp.bfloat16),
                         preferred_element_type=jnp.float32)
                 + b2.astype(jnp.float32))
    return out2d.reshape(B, N, -1)


# --------------------------------------------------------------------------
if __name__ == "__main__":
    key = jax.random.PRNGKey(0)
    kx, kw1, kb1, kw2, kb2, kx2, kx3 = jax.random.split(key, 7)

    in_features, hidden_features, out_features = 128, 256, 128

    # Synthetic Linear params, (in, out) layout (transpose of torch (out, in)).
    w1 = jax.random.normal(kw1, (in_features, hidden_features),
                           dtype=jnp.float32) / math.sqrt(in_features)
    b1 = jax.random.normal(kb1, (hidden_features,), dtype=jnp.float32) * 0.05
    w2 = jax.random.normal(kw2, (hidden_features, out_features),
                           dtype=jnp.float32) / math.sqrt(hidden_features)
    b2 = jax.random.normal(kb2, (out_features,), dtype=jnp.float32) * 0.05

    # One-time bf16 conversion of the weights (hoisted out of the call path).
    params = prepare_mlp_params(w1, b1, w2, b2)

    def check(x, Hsp, Wsp, **kw):
        out = jax.block_until_ready(
            mlp_forward(x, Hsp, Wsp, params, use_pallas=True, **kw))
        ref = jax.block_until_ready(
            mlp_forward(x, Hsp, Wsp, params, use_pallas=False))
        assert out.shape == ref.shape, (out.shape, ref.shape)
        err = float(jnp.max(jnp.abs(out - ref)))
        assert jnp.allclose(out, ref, atol=1e-2, rtol=1e-2), err
        return out

    # 1) 8x8 tokens, B=2 -> M=128 (single-step resident-weight path).
    x = jax.random.normal(kx, (2, 8 * 8, in_features), dtype=jnp.float32)
    check(x, 8, 8)

    # 2) Non-aligned M (1 x 7x7 -> M=49): masked partial row tile, no pad/slice.
    x_odd = jax.random.normal(kx2, (1, 7 * 7, in_features), dtype=jnp.float32)
    check(x_odd, 7, 7)

    # 3) M=512: row grid split into >=2 "parallel" steps (v7x dual-TC path).
    x_big = jax.random.normal(kx3, (2, 16 * 16, in_features), dtype=jnp.float32)
    check(x_big, 16, 16)

    # 4) Hf-tiled (accumulator) variant, forced at small shapes for coverage.
    check(x, 8, 8, force_hf_tile=True, hf_tile_cap=128)

    print("KERNEL_OK")
</pallas_src>

<mosaic_0001>
module attributes {stable_mosaic.version = 11 : i64} {
  func.func @_mlp_kernel_resident(%arg0: i32, %arg1: memref<128x128xf32, #tpu.memory_space<vmem>>, %arg2: memref<128x256xbf16, #tpu.memory_space<vmem>>, %arg3: memref<1x256xf32, #tpu.memory_space<vmem>>, %arg4: memref<256x128xbf16, #tpu.memory_space<vmem>>, %arg5: memref<1x128xf32, #tpu.memory_space<vmem>>, %arg6: memref<128x128xf32, #tpu.memory_space<vmem>>) attributes {dimension_semantics = [#tpu.dimension_semantics<parallel>], iteration_bounds = array<i64: 1>, scalar_prefetch = 0 : i64, scratch_operands = 0 : i64, tpu.core_type = #tpu.core_type<tc>, window_params = [{transform_indices = @transform_0, window_bounds = array<i64: 128, 128>}, {pipeline_mode = #tpu.pipeline_mode<synchronous>, transform_indices = @transform_1, window_bounds = array<i64: 128, 256>}, {pipeline_mode = #tpu.pipeline_mode<synchronous>, transform_indices = @transform_2, window_bounds = array<i64: 1, 256>}, {pipeline_mode = #tpu.pipeline_mode<synchronous>, transform_indices = @transform_3, window_bounds = array<i64: 256, 128>}, {pipeline_mode = #tpu.pipeline_mode<synchronous>, transform_indices = @transform_4, window_bounds = array<i64: 1, 128>}, {transform_indices = @transform_5, window_bounds = array<i64: 128, 128>}]} {
    %c0 = arith.constant 0 : index
    %c0_0 = arith.constant 0 : index
    %0 = vector.load %arg1[%c0, %c0_0] : memref<128x128xf32, #tpu.memory_space<vmem>>, vector<128x128xf32>
    %1 = arith.truncf %0 : vector<128x128xf32> to vector<128x128xbf16>
    %c0_1 = arith.constant 0 : index
    %c0_2 = arith.constant 0 : index
    %2 = vector.load %arg2[%c0_1, %c0_2] : memref<128x256xbf16, #tpu.memory_space<vmem>>, vector<128x256xbf16>
    %cst = arith.constant dense<0.000000e+00> : vector<128x256xf32>
    %3 = tpu.matmul %1, %2, %cst {dimension_numbers = #tpu.dot_dimension_numbers<[1], [0], [0], [1], [0, 0, 1, 1], [], []>} : vector<128x128xbf16>, vector<128x256xbf16>, vector<128x256xf32> -> vector<128x256xf32>
    %c0_3 = arith.constant 0 : index
    %c0_4 = arith.constant 0 : index
    %4 = vector.load %arg3[%c0_3, %c0_4] : memref<1x256xf32, #tpu.memory_space<vmem>>, vector<1x256xf32>
    %5 = vector.broadcast %4 : vector<1x256xf32> to vector<128x256xf32>
    %6 = arith.addf %3, %5 : vector<128x256xf32>
    %cst_5 = arith.constant 5.000000e-01 : f32
    %7 = vector.broadcast %cst_5 : f32 to vector<128x256xf32>
    %8 = arith.mulf %7, %6 : vector<128x256xf32>
    %cst_6 = arith.constant 0.797884583 : f32
    %9 = vector.broadcast %cst_6 : f32 to vector<128x256xf32>
    %10 = arith.mulf %9, %6 : vector<128x256xf32>
    %cst_7 = arith.constant 4.471500e-02 : f32
    %11 = vector.broadcast %cst_7 : f32 to vector<128x256xf32>
    %12 = arith.mulf %11, %6 : vector<128x256xf32>
    %13 = arith.mulf %12, %6 : vector<128x256xf32>
    %cst_8 = arith.constant 1.000000e+00 : f32
    %14 = vector.broadcast %cst_8 : f32 to vector<128x256xf32>
    %15 = arith.addf %14, %13 : vector<128x256xf32>
    %16 = arith.mulf %10, %15 : vector<128x256xf32>
    %17 = math.tanh %16 : vector<128x256xf32>
    %cst_9 = arith.constant 1.000000e+00 : f32
    %18 = vector.broadcast %cst_9 : f32 to vector<128x256xf32>
    %19 = arith.addf %18, %17 : vector<128x256xf32>
    %20 = arith.mulf %8, %19 : vector<128x256xf32>
    %21 = arith.truncf %20 : vector<128x256xf32> to vector<128x256xbf16>
    %c0_10 = arith.constant 0 : index
    %c0_11 = arith.constant 0 : index
    %22 = vector.load %arg4[%c0_10, %c0_11] : memref<256x128xbf16, #tpu.memory_space<vmem>>, vector<256x128xbf16>
    %cst_12 = arith.constant dense<0.000000e+00> : vector<128x128xf32>
    %23 = tpu.matmul %21, %22, %cst_12 {dimension_numbers = #tpu.dot_dimension_numbers<[1], [0], [0], [1], [0, 0, 1, 1], [], []>} : vector<128x256xbf16>, vector<256x128xbf16>, vector<128x128xf32> -> vector<128x128xf32>
    %c0_13 = arith.constant 0 : index
    %c0_14 = arith.constant 0 : index
    %24 = vector.load %arg5[%c0_13, %c0_14] : memref<1x128xf32, #tpu.memory_space<vmem>>, vector<1x128xf32>
    %25 = vector.broadcast %24 : vector<1x128xf32> to vector<128x128xf32>
    %26 = arith.addf %23, %25 : vector<128x128xf32>
    %c0_15 = arith.constant 0 : index
    %c0_16 = arith.constant 0 : index
    %27 = vector.load %arg6[%c0_15, %c0_16] : memref<128x128xf32, #tpu.memory_space<vmem>>, vector<128x128xf32>
    tpu.vector_store %arg6[%c0_15, %c0_16], %26 {strides = array<i32>} : memref<128x128xf32, #tpu.memory_space<vmem>>, vector<128x128xf32>,
    return
  }
  func.func @transform_0(%arg0: i32) -> (i32, i32) {
    %c0_i32 = arith.constant 0 : i32
    %c0_i32_0 = arith.constant 0 : i32
    return %arg0, %c0_i32 : i32, i32
  }
  func.func @transform_1(%arg0: i32) -> (i32, i32) {
    %c0_i32 = arith.constant 0 : i32
    %c0_i32_0 = arith.constant 0 : i32
    %c0_i32_1 = arith.constant 0 : i32
    return %c0_i32, %c0_i32_0 : i32, i32
  }
  func.func @transform_2(%arg0: i32) -> (i32, i32) {
    %c0_i32 = arith.constant 0 : i32
    %c0_i32_0 = arith.constant 0 : i32
    %c0_i32_1 = arith.constant 0 : i32
    return %c0_i32, %c0_i32_0 : i32, i32
  }
  func.func @transform_3(%arg0: i32) -> (i32, i32) {
    %c0_i32 = arith.constant 0 : i32
    %c0_i32_0 = arith.constant 0 : i32
    %c0_i32_1 = arith.constant 0 : i32
    return %c0_i32, %c0_i32_0 : i32, i32
  }
  func.func @transform_4(%arg0: i32) -> (i32, i32) {
    %c0_i32 = arith.constant 0 : i32
    %c0_i32_0 = arith.constant 0 : i32
    %c0_i32_1 = arith.constant 0 : i32
    return %c0_i32, %c0_i32_0 : i32, i32
  }
  func.func @transform_5(%arg0: i32) -> (i32, i32) {
    %c0_i32 = arith.constant 0 : i32
    %c0_i32_0 = arith.constant 0 : i32
    return %arg0, %c0_i32 : i32, i32
  }
}

module attributes {stable_mosaic.version = 11 : i64} {
  func.func @_mlp_kernel_resident(%arg0: i32, %arg1: memref<128x128xf32, #tpu.memory_space<vmem>>, %arg2: memref<128x256xbf16, #tpu.memory_space<vmem>>, %arg3: memref<1x256xf32, #tpu.memory_space<vmem>>, %arg4: memref<256x128xbf16, #tpu.memory_space<vmem>>, %arg5: memref<1x128xf32, #tpu.memory_space<vmem>>, %arg6: memref<128x128xf32, #tpu.memory_space<vmem>>) attributes {dimension_semantics = [#tpu.dimension_semantics<parallel>], iteration_bounds = array<i64: 1>, scalar_prefetch = 0 : i64, scratch_operands = 0 : i64, tpu.core_type = #tpu.core_type<tc>, window_params = [{transform_indices = @transform_0, window_bounds = array<i64: 128, 128>}, {pipeline_mode = #tpu.pipeline_mode<synchronous>, transform_indices = @transform_1, window_bounds = array<i64: 128, 256>}, {pipeline_mode = #tpu.pipeline_mode<synchronous>, transform_indices = @transform_2, window_bounds = array<i64: 1, 256>}, {pipeline_mode = #tpu.pipeline_mode<synchronous>, transform_indices = @transform_3, window_bounds = array<i64: 256, 128>}, {pipeline_mode = #tpu.pipeline_mode<synchronous>, transform_indices = @transform_4, window_bounds = array<i64: 1, 128>}, {transform_indices = @transform_5, window_bounds = array<i64: 128, 128>}]} {
    %c0 = arith.constant 0 : index
    %c0_0 = arith.constant 0 : index
    %0 = vector.load %arg1[%c0, %c0_0] : memref<128x128xf32, #tpu.memory_space<vmem>>, vector<128x128xf32>
    %1 = arith.truncf %0 : vector<128x128xf32> to vector<128x128xbf16>
    %c0_1 = arith.constant 0 : index
    %c0_2 = arith.constant 0 : index
    %2 = vector.load %arg2[%c0_1, %c0_2] : memref<128x256xbf16, #tpu.memory_space<vmem>>, vector<128x256xbf16>
    %cst = arith.constant dense<0.000000e+00> : vector<128x256xf32>
    %3 = tpu.matmul %1, %2, %cst {dimension_numbers = #tpu.dot_dimension_numbers<[1], [0], [0], [1], [0, 0, 1, 1], [], []>} : vector<128x128xbf16>, vector<128x256xbf16>, vector<128x256xf32> -> vector<128x256xf32>
    %c0_3 = arith.constant 0 : index
    %c0_4 = arith.constant 0 : index
    %4 = vector.load %arg3[%c0_3, %c0_4] : memref<1x256xf32, #tpu.memory_space<vmem>>, vector<1x256xf32>
    %5 = vector.broadcast %4 : vector<1x256xf32> to vector<128x256xf32>
    %6 = arith.addf %3, %5 : vector<128x256xf32>
    %cst_5 = arith.constant 5.000000e-01 : f32
    %7 = vector.broadcast %cst_5 : f32 to vector<128x256xf32>
    %8 = arith.mulf %7, %6 : vector<128x256xf32>
    %cst_6 = arith.constant 0.797884583 : f32
    %9 = vector.broadcast %cst_6 : f32 to vector<128x256xf32>
    %10 = arith.mulf %9, %6 : vector<128x256xf32>
    %cst_7 = arith.constant 4.471500e-02 : f32
    %11 = vector.broadcast %cst_7 : f32 to vector<128x256xf32>
    %12 = arith.mulf %11, %6 : vector<128x256xf32>
    %13 = arith.mulf %12, %6 : vector<128x256xf32>
    %cst_8 = arith.constant 1.000000e+00 : f32
    %14 = vector.broadcast %cst_8 : f32 to vector<128x256xf32>
    %15 = arith.addf %14, %13 : vector<128x256xf32>
    %16 = arith.mulf %10, %15 : vector<128x256xf32>
    %17 = math.tanh %16 : vector<128x256xf32>
    %cst_9 = arith.constant 1.000000e+00 : f32
    %18 = vector.broadcast %cst_9 : f32 to vector<128x256xf32>
    %19 = arith.addf %18, %17 : vector<128x256xf32>
    %20 = arith.mulf %8, %19 : vector<128x256xf32>
    %21 = arith.truncf %20 : vector<128x256xf32> to vector<128x256xbf16>
    %c0_10 = arith.constant 0 : index
    %c0_11 = arith.constant 0 : index
    %22 = vector.load %arg4[%c0_10, %c0_11] : memref<256x128xbf16, #tpu.memory_space<vmem>>, vector<256x128xbf16>
    %cst_12 = arith.constant dense<0.000000e+00> : vector<128x128xf32>
    %23 = tpu.matmul %21, %22, %cst_12 {dimension_numbers = #tpu.dot_dimension_numbers<[1], [0], [0], [1], [0, 0, 1, 1], [], []>} : vector<128x256xbf16>, vector<256x128xbf16>, vector<128x128xf32> -> vector<128x128xf32>
    %c0_13 = arith.constant 0 : index
    %c0_14 = arith.constant 0 : index
    %24 = vector.load %arg5[%c0_13, %c0_14] : memref<1x128xf32, #tpu.memory_space<vmem>>, vector<1x128xf32>
    %25 = vector.broadcast %24 : vector<1x128xf32> to vector<128x128xf32>
    %26 = arith.addf %23, %25 : vector<128x128xf32>
    %c0_15 = arith.constant 0 : index
    %c0_16 = arith.constant 0 : index
    %27 = vector.load %arg6[%c0_15, %c0_16] : memref<128x128xf32, #tpu.memory_space<vmem>>, vector<128x128xf32>
    tpu.vector_store %arg6[%c0_15, %c0_16], %26 {strides = array<i32>} : memref<128x128xf32, #tpu.memory_space<vmem>>, vector<128x128xf32>,
    return
  }
  func.func @transform_0(%arg0: i32) -> (i32, i32) {
    %c0_i32 = arith.constant 0 : i32
    %c0_i32_0 = arith.constant 0 : i32
    return %arg0, %c0_i32 : i32, i32
  }
  func.func @transform_1(%arg0: i32) -> (i32, i32) {
    %c0_i32 = arith.constant 0 : i32
    %c0_i32_0 = arith.constant 0 : i32
    %c0_i32_1 = arith.constant 0 : i32
    return %c0_i32, %c0_i32_0 : i32, i32
  }
  func.func @transform_2(%arg0: i32) -> (i32, i32) {
    %c0_i32 = arith.constant 0 : i32
    %c0_i32_0 = arith.constant 0 : i32
    %c0_i32_1 = arith.constant 0 : i32
    return %c0_i32, %c0_i32_0 : i32, i32
  }
  func.func @transform_3(%arg0: i32) -> (i32, i32) {
    %c0_i32 = arith.constant 0 : i32
    %c0_i32_0 = arith.constant 0 : i32
    %c0_i32_1 = arith.constant 0 : i32
    return %c0_i32, %c0_i32_0 : i32, i32
  }
  func.func @transform_4(%arg0: i32) -> (i32, i32) {
    %c0_i32 = arith.constant 0 : i32
    %c0_i32_0 = arith.constant 0 : i32
    %c0_i32_1 = arith.constant 0 : i32
    return %c0_i32, %c0_i32_0 : i32, i32
  }
  func.func @transform_5(%arg0: i32) -> (i32, i32) {
    %c0_i32 = arith.constant 0 : i32
    %c0_i32_0 = arith.constant 0 : i32
    return %arg0, %c0_i32 : i32, i32
  }
}

</mosaic_0001>

<bundles_post_ra>
// kernel: tpu_custom_call.1
= control target key start
LH: loop header
LB: loop body
LE: loop exit
PB: predicated region body
PF: predicated region fallthrough
CT: control target
= control target key end

     0   :  { %10 = vsyncpa [#allocation3], 0  ;;  %s1494_s0 = inlined_call_operand.hbm [shape: f32[128,128], index: 0, kind: input, shape index: {}]   ;;  %s1495_s1 = inlined_call_operand.hbm [shape: bf16[128,256], index: 1, kind: input, shape index: {}]   ;;  %s1496_s2 = inlined_call_operand.vmem [shape: f32[1,256], index: 2, kind: input, shape index: {}]   ;;  %s1497_s3 = inlined_call_operand.hbm [shape: bf16[256,128], index: 3, kind: input, shape index: {}]   ;;  %s1498_s4 = inlined_call_operand.vmem [shape: f32[1,128], index: 4, kind: input, shape index: {}]   ;;  %s1499_s5 = inlined_call_operand.hbm [shape: f32[128,128], index: 5, kind: output, shape index: {}]  }
   0x1   :  { %11 = vsyncpa [#allocation6], 0 }
   0x2   :  { %12 = vsyncpa [#allocation4], 0  ;;  %s1174_s18 = smov [#allocation5]   ;;  %s1175_s20 = smov [#allocation2]  }
   0x3   :  { %s30_s19 = sshll.u32 %s1174_s18, 4  ;;  %s18_s21 = sshll.u32 %s1175_s20, 4  ;;  %s31_s19 = int_to_ptr.vmem [resolvable:$true] %s30_s19  ;;  %s19_s21 = int_to_ptr.vmem [resolvable:$true] %s18_s21 }
   0x4   :  { %s1096_s22 = scalar_lea.vmem %s31_s19, 2048  ;;  %p1101_p1 = scmp.lt.s32.totalorder %s31_s19, %s31_s19 }
   0x5   :  { %p1097_p0 = scmp.ne.s32.totalorder %s31_s19, %s1096_s22  ;;  %p1102_p2 = scmp.lt.s32.totalorder %s1096_s22, %s1096_s22 }
   0x7   :  { %p1103_p3 = por %p1102_p2, %p1101_p1 }
   0x9   :  { %p1104_p4 = pnand %p1103_p3, %p1097_p0 }
   0xb   :  { %1107 = shalt.err (!%p1104_p4)
}
   0xc   :  { %s1176_s23 = smov 128   ;;  %s1177_s24 = smov 8  }
   0xd   :  { %36 = dma.hbm_to_vmem [thread:$0]  %s1495_s1, 2048, %s31_s19, [#allocation6], %s1176_s23, %s1176_s23, %s1177_s24  }
   0xe   :  { %s1116_s27 = scalar_lea.vmem %s19_s21, 2048  ;;  %p1121_p6 = scmp.lt.s32.totalorder %s19_s21, %s19_s21 }
   0xf   :  { %p1117_p5 = scmp.ne.s32.totalorder %s19_s21, %s1116_s27  ;;  %p1122_p7 = scmp.lt.s32.totalorder %s1116_s27, %s1116_s27 }
  0x11   :  { %p1123_p8 = por %p1122_p7, %p1121_p6 }
  0x13   :  { %p1124_p9 = pnand %p1123_p8, %p1117_p5 }
  0x15   :  { %1127 = shalt.err (!%p1124_p9)
}
  0x16   :  { %24 = dma.hbm_to_vmem [thread:$0]  %s1494_s0, 2048, %s19_s21, [#allocation3], %s1176_s23, %s1176_s23, %s1177_s24  }
  0x17   :  { %s1178_s30 = smov [#allocation7]  }
  0x18   :  { %s44_s6 = sshll.u32 %s1178_s30, 4  ;;  %s45_s6 = int_to_ptr.vmem [resolvable:$true] %s44_s6 }
  0x19   :  { %s1136_s7 = scalar_lea.vmem %s45_s6, 2048  ;;  %p1141_p11 = scmp.lt.s32.totalorder %s45_s6, %s45_s6 }
  0x1a   :  { %p1137_p10 = scmp.ne.s32.totalorder %s45_s6, %s1136_s7  ;;  %p1142_p12 = scmp.lt.s32.totalorder %s1136_s7, %s1136_s7 }
  0x1c   :  { %p1143_p13 = por %p1142_p12, %p1141_p11 }
  0x1e   :  { %p1144_p0 = pnand %p1143_p13, %p1137_p10 }
  0x20   :  { %1147 = shalt.err (!%p1144_p0)
}
  0x21   :  { %s1179_s1 = smov 64   ;;  %s1180_s8 = smov 4  }
  0x22   :  { %50 = dma.hbm_to_vmem [thread:$0]  %s1497_s3, 2048, %s45_s6, [#allocation6], %s1179_s1, %s1179_s1, %s1180_s8  }
  0x23   :  { %1168 = dma.done.wait [#allocation3], 2048  }
  0x24   :  { %1169 = vsyncadd [#allocation3], 4294965248 }
  0x25   :  { %1170 = dma.done.wait [#allocation6], 4096  }
  0x26   :  { %1171 = vsyncadd [#allocation6], 4294963200  ;;  %v1181_v0 = vmov 0   ;;  %v984_v1 = vld [vmem:[#allocation5 + $0x74] ss:$8 sps:$4 sm:$0xff]   ;;  %v63_v17 = vld [vmem:[#allocation2] sm:$0xff]  ;;  %v105_v57 = vlaneseq }
  0x27   :  { %227 = vmatprep.mubr.bf16.mxu0 %v1181_v0  ;;  %v986_v2 = vld [vmem:[#allocation5 + $0x70] ss:$8 sps:$4 sm:$0xff]   ;;  %195 = vmatprep.subr.bf16.mxu0 %v984_v1  ;;  %v987_v3 = vld [vmem:[#allocation5 + $0x64] ss:$8 sps:$4 sm:$0xff]   ;;  %v989_v4 = vld [vmem:[#allocation5 + $0x60] ss:$8 sps:$4 sm:$0xff]  }
  0x28   :  { %196 = vmatpush1.bf16.msra.mxu0 %v986_v2  ;;  %v990_v5 = vld [vmem:[#allocation5 + $0x54] ss:$8 sps:$4 sm:$0xff]   ;;  %v992_v6 = vld [vmem:[#allocation5 + $0x50] ss:$8 sps:$4 sm:$0xff]   ;;  %v993_v7 = vld [vmem:[#allocation5 + $0x44] ss:$8 sps:$4 sm:$0xff]  }
  0x29   :  { %197 = vmatprep.subr.bf16.mxu0 %v987_v3  ;;  %v995_v8 = vld [vmem:[#allocation5 + $0x40] ss:$8 sps:$4 sm:$0xff]   ;;  %v996_v9 = vld [vmem:[#allocation5 + $0x34] ss:$8 sps:$4 sm:$0xff]   ;;  %v998_v10 = vld [vmem:[#allocation5 + $0x30] ss:$8 sps:$4 sm:$0xff]  }
  0x2a   :  { %v999_v11 = vld [vmem:[#allocation5 + $0x24] ss:$8 sps:$4 sm:$0xff]   ;;  %v1001_v12 = vld [vmem:[#allocation5 + $0x20] ss:$8 sps:$4 sm:$0xff]   ;;  %v1002_v13 = vld [vmem:[#allocation5 + $0x14] ss:$8 sps:$4 sm:$0xff]  }
  0x2b   :  { %v1004_v14 = vld [vmem:[#allocation5 + $0x10] ss:$8 sps:$4 sm:$0xff]   ;;  %v1005_v15 = vld [vmem:[#allocation5 + $0x4] ss:$8 sps:$4 sm:$0xff]   ;;  %v1007_v16 = vld [vmem:[#allocation5] ss:$8 sps:$4 sm:$0xff]  }
  0x2c   :  { %198 = vmatpush1.bf16.msra.mxu0 %v989_v4  ;;  %v64_v18 = vld [vmem:[#allocation2 + $0x8] sm:$0xff]  ;;  %v65_v20 = vld [vmem:[#allocation2 + $0x10] sm:$0xff]  ;;  %v66_v21 = vld [vmem:[#allocation2 + $0x18] sm:$0xff]  ;;  %v106_v58 = vshrl.u32 %v105_v57, 7 }
  0x2d   :  { %199 = vmatprep.subr.bf16.mxu0 %v990_v5  ;;  %v79_v19 = vpack.c.bf16 %v64_v18, %v63_v17  ;;  %v80_v22 = vpack.c.bf16 %v66_v21, %v65_v20  ;;  %v67_v23 = vld [vmem:[#allocation2 + $0x20] sm:$0xff]  ;;  %v68_v24 = vld [vmem:[#allocation2 + $0x28] sm:$0xff]  ;;  %v69_v26 = vld [vmem:[#allocation2 + $0x30] sm:$0xff] }
  0x2e   :  { %v81_v25 = vpack.c.bf16 %v68_v24, %v67_v23  ;;  %v70_v27 = vld [vmem:[#allocation2 + $0x38] sm:$0xff]  ;;  %v71_v29 = vld [vmem:[#allocation2 + $0x40] sm:$0xff]  ;;  %v72_v30 = vld [vmem:[#allocation2 + $0x48] sm:$0xff]  ;;  %v107_v59 = vsub.s32 0, %v106_v58  ;;  %v111_v61 = vsub.s32 1, %v106_v58 }
  0x2f   :  { %v82_v28 = vpack.c.bf16 %v70_v27, %v69_v26  ;;  %v83_v31 = vpack.c.bf16 %v72_v30, %v71_v29  ;;  %v73_v32 = vld [vmem:[#allocation2 + $0x50] sm:$0xff]  ;;  %v74_v33 = vld [vmem:[#allocation2 + $0x58] sm:$0xff]  ;;  %v75_v35 = vld [vmem:[#allocation2 + $0x60] sm:$0xff] }
  0x30   :  { %200 = vmatpush1.bf16.msra.mxu0 %v992_v6  ;;  %v84_v34 = vpack.c.bf16 %v74_v33, %v73_v32  ;;  %v76_v36 = vld [vmem:[#allocation2 + $0x68] sm:$0xff]  ;;  %v77_v38 = vld [vmem:[#allocation2 + $0x70] sm:$0xff]  ;;  %v78_v39 = vld [vmem:[#allocation2 + $0x78] sm:$0xff] }
  0x31   :  { %201 = vmatprep.subr.bf16.mxu0 %v993_v7  ;;  %v85_v37 = vpack.c.bf16 %v76_v36, %v75_v35  ;;  %v86_v40 = vpack.c.bf16 %v78_v39, %v77_v38  ;;  %v1008_v41 = vld [vmem:[#allocation7 + $0x78] sm:$0xff]   ;;  %v1010_v43 = vld [vmem:[#allocation7 + $0x70] sm:$0xff]   ;;  %v1012_v45 = vld [vmem:[#allocation7 + $0x68] sm:$0xff]  }
  0x32   :  { %v1009_v42 = vld [vmem:[#allocation7 + $0x38] sm:$0xff]   ;;  %911 = vmatprep.subr.bf16.mxu1 %v1008_v41  ;;  %v1011_v44 = vld [vmem:[#allocation7 + $0x30] sm:$0xff]   ;;  %v1013_v46 = vld [vmem:[#allocation7 + $0x28] sm:$0xff]  }
  0x33   :  { %912 = vmatpush3.bf16.msra.mxu1 %v1009_v42  ;;  %v1014_v47 = vld [vmem:[#allocation7 + $0x60] sm:$0xff]   ;;  %v1016_v49 = vld [vmem:[#allocation7 + $0x58] sm:$0xff]   ;;  %v1018_v51 = vld [vmem:[#allocation7 + $0x50] sm:$0xff]  }
  0x34   :  { %202 = vmatpush1.bf16.msra.mxu0 %v995_v8  ;;  %913 = vmatprep.subr.bf16.mxu1 %v1010_v43  ;;  %v1015_v48 = vld [vmem:[#allocation7 + $0x20] sm:$0xff]   ;;  %v1017_v50 = vld [vmem:[#allocation7 + $0x18] sm:$0xff]   ;;  %v1019_v52 = vld [vmem:[#allocation7 + $0x10] sm:$0xff]  }
  0x35   :  { %203 = vmatprep.subr.bf16.mxu0 %v996_v9  ;;  %v1020_v53 = vld [vmem:[#allocation7 + $0x48] sm:$0xff]   ;;  %v1022_v55 = vld [vmem:[#allocation7 + $0x40] sm:$0xff]  }
  0x36   :  { %v1021_v54 = vld [vmem:[#allocation7 + $0x8] sm:$0xff]   ;;  %v1023_v56 = vld [vmem:[#allocation7] sm:$0xff]  }
  0x37   :  { %914 = vmatpush3.bf16.msra.mxu1 %v1011_v44  ;;  %v103_v60 = vld [vmem:[%s1496_s2] sm:$0x3] }
  0x38   :  { %204 = vmatpush1.bf16.msra.mxu0 %v998_v10  ;;  %915 = vmatprep.subr.bf16.mxu1 %v1012_v45  ;;  %v1239_v62 = vrot.slane %v103_v60, %v107_v59  ;;  %v1241_v63 = vrot.slane %v103_v60, %v111_v61 }
  0x39   :  { %205 = vmatprep.subr.bf16.mxu0 %v999_v11 }
  0x3b   :  { %916 = vmatpush3.bf16.msra.mxu1 %v1013_v46 }
  0x3c   :  { %206 = vmatpush1.bf16.msra.mxu0 %v1001_v12  ;;  %917 = vmatprep.subr.bf16.mxu1 %v1014_v47 }
  0x3d   :  { %207 = vmatprep.subr.bf16.mxu0 %v1002_v13 }
  0x3f   :  { %918 = vmatpush3.bf16.msra.mxu1 %v1015_v48 }
  0x40   :  { %208 = vmatpush1.bf16.msra.mxu0 %v1004_v14  ;;  %919 = vmatprep.subr.bf16.mxu1 %v1016_v49 }
  0x41   :  { %209 = vmatprep.subr.bf16.mxu0 %v1005_v15 }
  0x43   :  { %920 = vmatpush3.bf16.msra.mxu1 %v1017_v50 }
  0x44   :  { %210 = vmatpush1.bf16.msra.mxu0 %v1007_v16  ;;  %921 = vmatprep.subr.bf16.mxu1 %v1018_v51 }
  0x47   :  { %228 = vmatmul.mubr.bf16.vlgmr.msra.gmra.mxu0 %v79_v19  ;;  %922 = vmatpush3.bf16.msra.mxu1 %v1019_v52 }
  0x48   :  { %237 = vmatprep.mubr.bf16.mxu0 %v1181_v0  ;;  %923 = vmatprep.subr.bf16.mxu1 %v1020_v53 }
  0x4b   :  { %924 = vmatpush3.bf16.msra.mxu1 %v1021_v54 }
  0x4c   :  { %925 = vmatprep.subr.bf16.mxu1 %v1022_v55 }
  0x4f   :  { %238 = vmatmul.mubr.bf16.gmra.mxu0 %v80_v22  ;;  %926 = vmatpush3.bf16.msra.mxu1 %v1023_v56 }
  0x50   :  { %247 = vmatprep.mubr.bf16.mxu0 %v1181_v0 }
  0x57   :  { %248 = vmatmul.mubr.bf16.gmra.mxu0 %v81_v25 }
  0x58   :  { %257 = vmatprep.mubr.bf16.mxu0 %v1181_v0 }
  0x5f   :  { %258 = vmatmul.mubr.bf16.gmra.mxu0 %v82_v28 }
  0x60   :  { %267 = vmatprep.mubr.bf16.mxu0 %v1181_v0 }
  0x67   :  { %268 = vmatmul.mubr.bf16.gmra.mxu0 %v83_v31 }
  0x68   :  { %277 = vmatprep.mubr.bf16.mxu0 %v1181_v0 }
  0x6f   :  { %278 = vmatmul.mubr.bf16.gmra.mxu0 %v84_v34 }
  0x70   :  { %287 = vmatprep.mubr.bf16.mxu0 %v1181_v0 }
  0x77   :  { %288 = vmatmul.mubr.bf16.gmra.mxu0 %v85_v37 }
  0x78   :  { %297 = vmatprep.mubr.bf16.mxu0 %v1181_v0 }
  0x7f   :  { %298 = vmatmul.mubr.bf16.gmra.mxu0 %v86_v40 }
 0x107   :  { %v229_v0 = vpop.f32.mrf.mxu0 }
 0x108   :  { %v230_v1 = vadd.f32 %v229_v0, %v1239_v62 }
 0x109   :  { %v231_v2 = vpop.f32.mrf.mxu0 }
 0x10a   :  { %v372_v3 = vmul.f32 0.044715, %v230_v1  ;;  %v232_v4 = vadd.f32 %v231_v2, %v1241_v63  ;;  %v340_v10 = vmul.f32 0.7978846, %v230_v1  ;;  %v1250_v33 = vmul.f32 0.5, %v230_v1 }
 0x10b   :  { %v233_v5 = vpop.f32.mrf.mxu0 }
 0x10c   :  { %v404_v6 = vmul.f32 %v372_v3, %v230_v1  ;;  %v373_v7 = vmul.f32 0.044715, %v232_v4  ;;  %v234_v8 = vadd.f32 %v233_v5, %v1239_v62  ;;  %v341_v20 = vmul.f32 0.7978846, %v232_v4 }
 0x10d   :  { %v235_v9 = vpop.f32.mrf.mxu0  ;;  %v1252_v38 = vmul.f32 0.5, %v232_v4 }
 0x10e   :  { %v436_v11 = vadd.f32 1.0, %v404_v6  ;;  %v405_v12 = vmul.f32 %v373_v7, %v232_v4  ;;  %v374_v13 = vmul.f32 0.044715, %v234_v8  ;;  %v236_v14 = vadd.f32 %v235_v9, %v1241_v63 }
 0x10f   :  { %v239_v15 = vpop.f32.mrf.mxu0  ;;  %v342_v23 = vmul.f32 0.7978846, %v234_v8  ;;  %v1258_v49 = vmul.f32 0.5, %v234_v8 }
 0x110   :  { %v468_v16 = vmul.f32 %v436_v11, %v340_v10  ;;  %v437_v17 = vadd.f32 1.0, %v405_v12  ;;  %v406_v18 = vmul.f32 %v374_v13, %v234_v8  ;;  %v240_v19 = vadd.f32 %v239_v15, %v1239_v62 }
 0x111   :  { %v375_v21 = vmul.f32 0.044715, %v236_v14  ;;  %v241_v22 = vpop.f32.mrf.mxu0  ;;  %v343_v34 = vmul.f32 0.7978846, %v236_v14  ;;  %v1256_v48 = vmul.f32 0.5, %v236_v14 }
 0x112   :  { %v438_v24 = vadd.f32 1.0, %v406_v18  ;;  %v376_v25 = vmul.f32 0.044715, %v240_v19  ;;  %1024 = vtanh.f32 %v468_v16  ;;  %v242_v27 = vadd.f32 %v241_v22, %v1241_v63 }
 0x113   :  { %v407_v26 = vmul.f32 %v375_v21, %v236_v14  ;;  %v243_v28 = vpop.f32.mrf.mxu0  ;;  %v469_v29 = vmul.f32 %v437_v17, %v341_v20  ;;  %v344_v39 = vmul.f32 0.7978846, %v240_v19  ;;  %v1260_v57 = vmul.f32 0.5, %v240_v19 }
 0x114   :  { %v470_v30 = vmul.f32 %v438_v24, %v342_v23  ;;  %v408_v31 = vmul.f32 %v376_v25, %v240_v19  ;;  %v244_v32 = vadd.f32 %v243_v28, %v1239_v62  ;;  %v377_v36 = vmul.f32 0.044715, %v242_v27 }
 0x115   :  { %v439_v35 = vadd.f32 1.0, %v407_v26  ;;  %v245_v37 = vpop.f32.mrf.mxu0  ;;  %1026 = vtanh.f32 %v469_v29  ;;  %v345_v54 = vmul.f32 0.7978846, %v242_v27  ;;  %v1265_v0 = vmul.f32 0.5, %v242_v27 }
 0x116   :  { %v440_v40 = vadd.f32 1.0, %v408_v31  ;;  %v378_v41 = vmul.f32 0.044715, %v244_v32  ;;  %1028 = vtanh.f32 %v470_v30  ;;  %v409_v42 = vmul.f32 %v377_v36, %v242_v27 }
 0x117   :  { %v246_v43 = vadd.f32 %v245_v37, %v1241_v63  ;;  %v249_v44 = vpop.f32.mrf.mxu0  ;;  %v471_v45 = vmul.f32 %v439_v35, %v343_v34  ;;  %v346_v58 = vmul.f32 0.7978846, %v244_v32  ;;  %v1270_v4 = vmul.f32 0.5, %v244_v32 }
 0x118   :  { %v410_v46 = vmul.f32 %v378_v41, %v244_v32  ;;  %v250_v47 = vadd.f32 %v249_v44, %v1239_v62  ;;  %v472_v50 = vmul.f32 %v440_v40, %v344_v39  ;;  %v441_v51 = vadd.f32 1.0, %v409_v42 }
 0x119   :  { %v379_v52 = vmul.f32 0.044715, %v246_v43  ;;  %v251_v53 = vpop.f32.mrf.mxu0  ;;  %1030 = vtanh.f32 %v471_v45  ;;  %v347_v5 = vmul.f32 0.7978846, %v246_v43  ;;  %v1278_v17 = vmul.f32 0.5, %v246_v43 }
 0x11a   :  { %v442_v55 = vadd.f32 1.0, %v410_v46  ;;  %v380_v56 = vmul.f32 0.044715, %v250_v47  ;;  %v1263_v60 = vadd.f32 %v251_v53, %v1241_v63  ;;  %v473_v1 = vmul.f32 %v441_v51, %v345_v54 }
 0x11b   :  { %v411_v59 = vmul.f32 %v379_v52, %v246_v43  ;;  %v253_v61 = vpop.f32.mrf.mxu0  ;;  %1032 = vtanh.f32 %v472_v50  ;;  %v348_v10 = vmul.f32 0.7978846, %v250_v47  ;;  %v1284_v21 = vmul.f32 0.5, %v250_v47 }
 0x11c   :  { %v412_v2 = vmul.f32 %v380_v56, %v250_v47  ;;  %v1268_v3 = vadd.f32 %v253_v61, %v1239_v62  ;;  %v381_v7 = vmul.f32 0.044715, %v1263_v60  ;;  %v474_v9 = vmul.f32 %v442_v55, %v346_v58 }
 0x11d   :  { %v443_v6 = vadd.f32 1.0, %v411_v59  ;;  %v255_v8 = vpop.f32.mrf.mxu0  ;;  %1034 = vtanh.f32 %v473_v1  ;;  %v349_v23 = vmul.f32 0.7978846, %v1263_v60 }
 0x11e   :  { %v444_v11 = vadd.f32 1.0, %v412_v2  ;;  %v382_v12 = vmul.f32 0.044715, %v1268_v3  ;;  %v413_v14 = vmul.f32 %v381_v7, %v1263_v60  ;;  %v1276_v15 = vadd.f32 %v255_v8, %v1241_v63 }
 0x11f   :  { %v475_v13 = vmul.f32 %v443_v6, %v347_v5  ;;  %v259_v16 = vpop.f32.mrf.mxu0  ;;  %v1025_v18 = vpop.eup %1024  ;;  %1036 = vtanh.f32 %v474_v9  ;;  %v350_v27 = vmul.f32 0.7978846, %v1268_v3 }
 0x120   :  { %v414_v19 = vmul.f32 %v382_v12, %v1268_v3  ;;  %v1282_v20 = vadd.f32 %v259_v16, %v1239_v62  ;;  %v476_v22 = vmul.f32 %v444_v11, %v348_v10  ;;  %v445_v24 = vadd.f32 1.0, %v413_v14 }
 0x121   :  { %v383_v25 = vmul.f32 0.044715, %v1276_v15  ;;  %v261_v26 = vpop.f32.mrf.mxu0  ;;  %1038 = vtanh.f32 %v475_v13  ;;  %v532_v35 = vadd.f32 1.0, %v1025_v18  ;;  %v351_v39 = vmul.f32 0.7978846, %v1276_v15 }
 0x122   :  { %v446_v28 = vadd.f32 1.0, %v414_v19  ;;  %v384_v29 = vmul.f32 0.044715, %v1282_v20  ;;  %v1027_v30 = vpop.eup %1026  ;;  %v1292_v32 = vadd.f32 %v261_v26, %v1241_v63  ;;  %v477_v37 = vmul.f32 %v445_v24, %v349_v23 }
 0x123   :  { %v415_v31 = vmul.f32 %v383_v25, %v1276_v15  ;;  %v263_v34 = vpop.f32.mrf.mxu0  ;;  %v1029_v36 = vpop.eup %1028  ;;  %1040 = vtanh.f32 %v476_v22  ;;  %v352_v43 = vmul.f32 0.7978846, %v1282_v20  ;;  %v533_v52 = vadd.f32 1.0, %v1027_v30 }
 0x124   :  { %v416_v40 = vmul.f32 %v384_v29, %v1282_v20  ;;  %v1297_v41 = vadd.f32 %v263_v34, %v1239_v62  ;;  %v385_v44 = vmul.f32 0.044715, %v1292_v32  ;;  %v478_v47 = vmul.f32 %v446_v28, %v350_v27 }
 0x125   :  { %v447_v42 = vadd.f32 1.0, %v415_v31  ;;  %v265_v45 = vpop.f32.mrf.mxu0  ;;  %v534_v58 = vadd.f32 1.0, %v1029_v36  ;;  %1042 = vtanh.f32 %v477_v37  ;;  %v353_v5 = vmul.f32 0.7978846, %v1292_v32 }
 0x126   :  { %v1031_v46 = vpop.eup %1030  ;;  %v448_v50 = vadd.f32 1.0, %v416_v40  ;;  %v386_v51 = vmul.f32 0.044715, %v1297_v41  ;;  %v417_v53 = vmul.f32 %v385_v44, %v1292_v32  ;;  %v1304_v54 = vadd.f32 %v265_v45, %v1241_v63 }
 0x127   :  { %v269_v55 = vpop.f32.mrf.mxu0  ;;  %v535_v56 = vadd.f32 1.0, %v1031_v46  ;;  %v479_v59 = vmul.f32 %v447_v42, %v351_v39  ;;  %1044 = vtanh.f32 %v478_v47  ;;  %v354_v10 = vmul.f32 0.7978846, %v1297_v41 }
 0x128   :  { %v418_v61 = vmul.f32 %v386_v51, %v1297_v41  ;;  %v1308_v1 = vadd.f32 %v269_v55, %v1239_v62  ;;  %v480_v2 = vmul.f32 %v448_v50, %v352_v43  ;;  %v449_v6 = vadd.f32 1.0, %v417_v53  ;;  %v1312_v9 = vpop.eup %1032 }
 0x129   :  { %v387_v7 = vmul.f32 0.044715, %v1304_v54  ;;  %v271_v8 = vpop.f32.mrf.mxu0  ;;  %v565_v18 = vmul.f32 %v533_v52, %v1252_v38  ;;  %v567_v19 = vmul.f32 %v535_v56, %v1256_v48  ;;  %1046 = vtanh.f32 %v479_v59 }
 0x12a   :  { %v450_v11 = vadd.f32 1.0, %v418_v61  ;;  %v388_v12 = vmul.f32 0.044715, %v1308_v1  ;;  %v1318_v14 = vadd.f32 %v271_v8, %v1241_v63  ;;  %v355_v22 = vmul.f32 0.7978846, %v1304_v54  ;;  %v1035_v25 = vpop.eup %1034 }
 0x12b   :  { %v419_v13 = vmul.f32 %v387_v7, %v1304_v54  ;;  %v273_v16 = vpop.f32.mrf.mxu0  ;;  %1048 = vtanh.f32 %v480_v2  ;;  %v481_v26 = vmul.f32 %v449_v6, %v353_v5  ;;  %v356_v38 = vmul.f32 0.7978846, %v1308_v1 }
 0x12c   :  { %v420_v23 = vmul.f32 %v388_v12, %v1308_v1  ;;  %v1325_v24 = vadd.f32 %v273_v16, %v1239_v62  ;;  %v389_v28 = vmul.f32 0.044715, %v1318_v14  ;;  %v482_v30 = vmul.f32 %v450_v11, %v354_v10  ;;  %v1037_v34 = vpop.eup %1036 }
 0x12d   :  { %v451_v27 = vadd.f32 1.0, %v419_v13  ;;  %v275_v29 = vpop.f32.mrf.mxu0  ;;  %v597_v37 = vpack.c.bf16 %v567_v19, %v565_v18  ;;  %v564_v40 = vmul.f32 %v532_v35, %v1250_v33  ;;  %v566_v46 = vmul.f32 %v534_v58, %v1258_v49 }
 0x12e   :  { %v452_v31 = vadd.f32 1.0, %v420_v23  ;;  %v390_v48 = vmul.f32 0.044715, %v1325_v24  ;;  %v421_v36 = vmul.f32 %v389_v28, %v1318_v14  ;;  %v1332_v39 = vadd.f32 %v275_v29, %v1241_v63  ;;  %v1039_v43 = vpop.eup %1038 }
 0x12f   :  { %v279_v42 = vpop.f32.mrf.mxu0  ;;  %v483_v44 = vmul.f32 %v451_v27, %v355_v22  ;;  %1050 = vtanh.f32 %v481_v26  ;;  %v357_v50 = vmul.f32 0.7978846, %v1318_v14  ;;  %779 = vmatprep.mubr.bf16.mxu1 %v597_v37  ;;  %v596_v56 = vpack.c.bf16 %v566_v46, %v564_v40 }
 0x130   :  { %v422_v45 = vmul.f32 %v390_v48, %v1325_v24  ;;  %v1338_v47 = vadd.f32 %v279_v42, %v1239_v62  ;;  %v453_v51 = vadd.f32 1.0, %v421_v36  ;;  %v391_v52 = vmul.f32 0.044715, %v1332_v39  ;;  %v1342_v55 = vpop.eup %1040 }
 0x131   :  { %v281_v53 = vpop.f32.mrf.mxu0  ;;  %1052 = vtanh.f32 %v482_v30  ;;  %v484_v33 = vmul.f32 %v452_v31, %v356_v38  ;;  %v358_v59 = vmul.f32 0.7978846, %v1325_v24  ;;  %780 = vmatmul.mubr.bf16.vlgmr.msra.gmra.mxu1 %v596_v56  ;;  %v537_v6 = vadd.f32 1.0, %v1035_v25 }
 0x132   :  { %v454_v35 = vadd.f32 1.0, %v422_v45  ;;  %v423_v49 = vmul.f32 %v391_v52, %v1332_v39  ;;  %v392_v58 = vmul.f32 0.044715, %v1338_v47  ;;  %v1348_v61 = vadd.f32 %v281_v53, %v1241_v63  ;;  %v1043_v8 = vpop.eup %1042 }
 0x133   :  { %v283_v2 = vpop.f32.mrf.mxu0  ;;  %1054 = vtanh.f32 %v483_v44  ;;  %v539_v7 = vadd.f32 1.0, %v1039_v43  ;;  %v485_v10 = vmul.f32 %v453_v51, %v357_v50  ;;  %v359_v11 = vmul.f32 0.7978846, %v1332_v39 }
 0x134   :  { %v1351_v5 = vadd.f32 %v283_v2, %v1239_v62  ;;  %v455_v12 = vadd.f32 1.0, %v423_v49  ;;  %v424_v13 = vmul.f32 %v392_v58, %v1338_v47  ;;  %1056 = vtanh.f32 %v484_v33  ;;  %v1357_v23 = vpop.eup %1044 }
 0x135   :  { %v285_v16 = vpop.f32.mrf.mxu0  ;;  %v486_v18 = vmul.f32 %v454_v35, %v358_v59  ;;  %v393_v19 = vmul.f32 0.044715, %v1348_v61  ;;  %v360_v26 = vmul.f32 0.7978846, %v1338_v47  ;;  %v569_v27 = vmul.f32 %v537_v6, %v1265_v0 }
 0x136   :  { %v394_v22 = vmul.f32 0.044715, %v1351_v5  ;;  %v456_v25 = vadd.f32 1.0, %v424_v13  ;;  %v571_v28 = vmul.f32 %v539_v7, %v1278_v17  ;;  %v487_v30 = vmul.f32 %v455_v12, %v359_v11  ;;  %v1047_v36 = vpop.eup %1046 }
 0x137   :  { %v289_v29 = vpop.f32.mrf.mxu0  ;;  %v425_v38 = vmul.f32 %v393_v19, %v1348_v61  ;;  %v1364_v31 = vadd.f32 %v285_v16, %v1241_v63  ;;  %v536_v48 = vadd.f32 1.0, %v1312_v9  ;;  %1058 = vtanh.f32 %v485_v10 }
 0x138   :  { %v426_v37 = vmul.f32 %v394_v22, %v1351_v5  ;;  %v599_v40 = vpack.c.bf16 %v571_v28, %v569_v27  ;;  %v538_v42 = vadd.f32 1.0, %v1037_v34  ;;  %v1368_v44 = vpop.eup %1048  ;;  %1060 = vtanh.f32 %v486_v18 }
 0x139   :  { %v291_v43 = vpop.f32.mrf.mxu0  ;;  %v457_v0 = vadd.f32 1.0, %v425_v38  ;;  %v395_v17 = vmul.f32 0.044715, %v1364_v31  ;;  %v317_v45 = vmul.f32 0.5, %v1263_v60  ;;  %v488_v46 = vmul.f32 %v456_v25, %v360_v26 }
 0x13a   :  { %787 = vmatprep.mubr.bf16.mxu1 %v599_v40  ;;  %v568_v50 = vmul.f32 %v536_v48, %v1260_v57  ;;  %v570_v9 = vmul.f32 %v538_v42, %v1270_v4  ;;  %v1375_v51 = vadd.f32 %v289_v29, %v1239_v62  ;;  %1062 = vtanh.f32 %v487_v30 }
 0x13b   :  { %v293_v52 = vpop.f32.mrf.mxu0  ;;  %v361_v34 = vmul.f32 0.7978846, %v1348_v61  ;;  %v427_v53 = vmul.f32 %v395_v17, %v1364_v31  ;;  %v1380_v33 = vadd.f32 %v291_v43, %v1241_v63  ;;  %v458_v35 = vadd.f32 1.0, %v426_v37 }
 0x13c   :  { %v598_v60 = vpack.c.bf16 %v570_v9, %v568_v50  ;;  %v396_v56 = vmul.f32 0.044715, %v1375_v51  ;;  %v1384_v57 = vadd.f32 %v293_v52, %v1239_v62  ;;  %v1386_v59 = vpop.eup %1050  ;;  %v363_v58 = vmul.f32 0.7978846, %v1364_v31 }
 0x13d   :  { %v295_v4 = vpop.f32.mrf.mxu0  ;;  %v489_v49 = vmul.f32 %v457_v0, %v361_v34  ;;  %v459_v2 = vadd.f32 1.0, %v427_v53  ;;  %v397_v6 = vmul.f32 0.044715, %v1380_v33  ;;  %1064 = vtanh.f32 %v488_v46 }
 0x13e   :  { %v1390_v7 = vpop.eup %1052  ;;  %v362_v10 = vmul.f32 0.7978846, %v1351_v5  ;;  %788 = vmatmul.mubr.bf16.gmra.mxu1 %v598_v60  ;;  %v428_v11 = vmul.f32 %v396_v56, %v1375_v51  ;;  %v398_v12 = vmul.f32 0.044715, %v1384_v57  ;;  %v364_v18 = vmul.f32 0.7978846, %v1375_v51 }
 0x13f   :  { %v299_v13 = vpop.f32.mrf.mxu0  ;;  %v491_v16 = vmul.f32 %v459_v2, %v363_v58  ;;  %v429_v19 = vmul.f32 %v397_v6, %v1380_v33  ;;  %v541_v22 = vadd.f32 1.0, %v1043_v8  ;;  %v319_v27 = vmul.f32 0.5, %v1276_v15 }
 0x140   :  { %v1055_v26 = vpop.eup %1054  ;;  %v460_v25 = vadd.f32 1.0, %v428_v11  ;;  %v543_v28 = vadd.f32 1.0, %v1047_v36  ;;  %v1399_v29 = vadd.f32 %v295_v4, %v1241_v63  ;;  %1066 = vtanh.f32 %v489_v49 }
 0x141   :  { %v301_v30 = vpop.f32.mrf.mxu0  ;;  %v490_v38 = vmul.f32 %v458_v35, %v362_v10  ;;  %v365_v48 = vmul.f32 0.7978846, %v1380_v33  ;;  %v461_v37 = vadd.f32 1.0, %v429_v19  ;;  %v1402_v40 = vpop.eup %1056  ;;  %v430_v43 = vmul.f32 %v398_v12, %v1384_v57 }
 0x142   :  { %v492_v42 = vmul.f32 %v460_v25, %v364_v18  ;;  %v573_v8 = vmul.f32 %v541_v22, %v317_v45  ;;  %v575_v0 = vmul.f32 %v543_v28, %v319_v27  ;;  %v399_v17 = vmul.f32 0.044715, %v1399_v29 }
 0x143   :  { %v318_v15 = vmul.f32 0.5, %v1268_v3  ;;  %v540_v36 = vadd.f32 1.0, %v1342_v55  ;;  %v542_v46 = vadd.f32 1.0, %v1357_v23  ;;  %v303_v50 = vpop.f32.mrf.mxu0  ;;  %1068 = vtanh.f32 %v491_v16 }
 0x144   :  { %v493_v9 = vmul.f32 %v461_v37, %v365_v48  ;;  %v601_v52 = vpack.c.bf16 %v575_v0, %v573_v8  ;;  %v1410_v34 = vadd.f32 %v299_v13, %v1239_v62  ;;  %v1059_v53 = vpop.eup %1058  ;;  %1070 = vtanh.f32 %v490_v38 }
 0x145   :  { %v431_v45 = vmul.f32 %v399_v17, %v1399_v29  ;;  %v572_v35 = vmul.f32 %v540_v36, %v1284_v21  ;;  %v574_v60 = vmul.f32 %v542_v46, %v318_v15  ;;  %v1414_v56 = vpop.eup %1060  ;;  %1072 = vtanh.f32 %v492_v42  ;;  %v305_v6 = vpop.f32.mrf.mxu0 }
 0x146   :  { %v462_v3 = vadd.f32 1.0, %v430_v43  ;;  %795 = vmatprep.mubr.bf16.mxu1 %v601_v52  ;;  %v367_v55 = vmul.f32 0.7978846, %v1399_v29  ;;  %v1418_v23 = vadd.f32 %v301_v30, %v1241_v63  ;;  %v400_v58 = vmul.f32 0.044715, %v1410_v34 }
 0x147   :  { %v463_v4 = vadd.f32 1.0, %v431_v45  ;;  %v600_v49 = vpack.c.bf16 %v574_v60, %v572_v35  ;;  %v1422_v2 = vadd.f32 %v303_v50, %v1239_v62  ;;  %v1063_v21 = vpop.eup %1062  ;;  %1074 = vtanh.f32 %v493_v9 }
 0x148   :  { %v366_v10 = vmul.f32 0.7978846, %v1384_v57  ;;  %v401_v11 = vmul.f32 0.044715, %v1418_v23  ;;  %v321_v16 = vmul.f32 0.5, %v1292_v32  ;;  %v545_v18 = vadd.f32 1.0, %v1386_v59 }
 0x149   :  { %v495_v12 = vmul.f32 %v463_v4, %v367_v55  ;;  %796 = vmatmul.mubr.bf16.gmra.mxu1 %v600_v49  ;;  %v402_v13 = vmul.f32 0.044715, %v1422_v2  ;;  %v323_v62 = vmul.f32 0.5, %v1304_v54  ;;  %v547_v22 = vadd.f32 1.0, %v1055_v26 }
 0x14a   :  { %v433_v19 = vmul.f32 %v401_v11, %v1418_v23  ;;  %v1432_v25 = vadd.f32 %v305_v6, %v1241_v63  ;;  %v1434_v27 = vpop.eup %1064  ;;  %v494_v28 = vmul.f32 %v462_v3, %v366_v10  ;;  %v432_v30 = vmul.f32 %v400_v58, %v1410_v34 }
 0x14b   :  { %1076 = vtanh.f32 %v495_v12  ;;  %v369_v38 = vmul.f32 0.7978846, %v1418_v23  ;;  %v577_v32 = vmul.f32 %v545_v18, %v321_v16  ;;  %v579_v37 = vmul.f32 %v547_v22, %v323_v62 }
 0x14c   :  { %v465_v48 = vadd.f32 1.0, %v433_v19  ;;  %v434_v59 = vmul.f32 %v402_v13, %v1422_v2  ;;  %v403_v42 = vmul.f32 0.044715, %v1432_v25  ;;  %v320_v54 = vmul.f32 0.5, %v1282_v20 }
 0x14d   :  { %v544_v63 = vadd.f32 1.0, %v1368_v44  ;;  %v1067_v26 = vpop.eup %1066  ;;  %v603_v8 = vpack.c.bf16 %v579_v37, %v577_v32  ;;  %v322_v0 = vmul.f32 0.5, %v1297_v41  ;;  %v546_v17 = vadd.f32 1.0, %v1390_v7 }
 0x14e   :  { %v497_v43 = vmul.f32 %v465_v48, %v369_v38  ;;  %1078 = vtanh.f32 %v494_v28  ;;  %v464_v15 = vadd.f32 1.0, %v432_v30  ;;  %v370_v36 = vmul.f32 0.7978846, %v1422_v2 }
 0x14f   :  { %v435_v46 = vmul.f32 %v403_v42, %v1432_v25  ;;  %803 = vmatprep.mubr.bf16.mxu1 %v603_v8  ;;  %v576_v50 = vmul.f32 %v544_v63, %v320_v54  ;;  %v578_v9 = vmul.f32 %v546_v17, %v322_v0  ;;  %v325_v20 = vmul.f32 0.5, %v1318_v14 }
 0x150   :  { %v549_v52 = vadd.f32 1.0, %v1059_v53  ;;  %v1069_v44 = vpop.eup %1068  ;;  %v371_v45 = vmul.f32 0.7978846, %v1432_v25  ;;  %v327_v41 = vmul.f32 0.5, %v1332_v39  ;;  %v551_v60 = vadd.f32 1.0, %v1063_v21 }
 0x151   :  { %v467_v35 = vadd.f32 1.0, %v435_v46  ;;  %v1071_v7 = vpop.eup %1070  ;;  %1080 = vtanh.f32 %v497_v43  ;;  %v466_v3 = vadd.f32 1.0, %v434_v59  ;;  %v602_v55 = vpack.c.bf16 %v578_v9, %v576_v50 }
 0x152   :  { %v581_v4 = vmul.f32 %v549_v52, %v325_v20  ;;  %v1073_v49 = vpop.eup %1072  ;;  %v583_v6 = vmul.f32 %v551_v60, %v327_v41  ;;  %v326_v10 = vmul.f32 0.5, %v1325_v24  ;;  %v550_v14 = vadd.f32 1.0, %v1414_v56 }
 0x153   :  { %v499_v58 = vmul.f32 %v467_v35, %v371_v45  ;;  %804 = vmatmul.mubr.bf16.gmra.mxu1 %v602_v55  ;;  %v548_v53 = vadd.f32 1.0, %v1402_v40  ;;  %v331_v11 = vmul.f32 0.5, %v1364_v31  ;;  %v553_v12 = vadd.f32 1.0, %v1067_v26 }
 0x154   :  { %v555_v39 = vadd.f32 1.0, %v1069_v44  ;;  %v1075_v21 = vpop.eup %1074  ;;  %v368_v13 = vmul.f32 0.7978846, %v1410_v34  ;;  %v605_v16 = vpack.c.bf16 %v583_v6, %v581_v4  ;;  %v329_v18 = vmul.f32 0.5, %v1348_v61  ;;  %v1470_v6 = vld [vmem:[%s1498_s4] ss:$0 sm:$0xff] }
 0x155   :  { %1082 = vtanh.f32 %v499_v58  ;;  %v498_v19 = vmul.f32 %v466_v3, %v370_v36  ;;  %v324_v62 = vmul.f32 0.5, %v1308_v1  ;;  %v582_v24 = vmul.f32 %v550_v14, %v326_v10  ;;  %s1182_s4 = smov [#allocation8]  }
 0x156   :  { %v587_v22 = vmul.f32 %v555_v39, %v331_v11  ;;  %811 = vmatprep.mubr.bf16.mxu1 %v605_v16  ;;  %v585_v56 = vmul.f32 %v553_v12, %v329_v18  ;;  %v496_v40 = vmul.f32 %v464_v15, %v368_v13  ;;  %v554_v32 = vadd.f32 1.0, %v1071_v7  ;;  %s865_s12 = sshll.u32 %s1182_s4, 4  ;;  %s866_s12 = int_to_ptr.vmem [resolvable:$true] %s865_s12 }
 0x157   :  { %v580_v30 = vmul.f32 %v548_v53, %v324_v62  ;;  %1084 = vtanh.f32 %v498_v19  ;;  %v335_v37 = vmul.f32 0.5, %v1399_v29  ;;  %v557_v59 = vadd.f32 1.0, %v1075_v21  ;;  %s1148_s13 = scalar_lea.vmem %s866_s12, 2048  ;;  %p1153_p2 = scmp.lt.s32.totalorder %s866_s12, %s866_s12 }
 0x158   :  { %v1077_v28 = vpop.eup %1076  ;;  %v607_v31 = vpack.c.bf16 %v587_v22, %v585_v56  ;;  %1086 = vtanh.f32 %v496_v40  ;;  %v330_v1 = vmul.f32 0.5, %v1351_v5  ;;  %v552_v61 = vadd.f32 1.0, %v1434_v27  ;;  %p1149_p1 = scmp.ne.s32.totalorder %s866_s12, %s1148_s13  ;;  %p1154_p3 = scmp.lt.s32.totalorder %s1148_s13, %s1148_s13 }
 0x159   :  { %v559_v38 = vadd.f32 1.0, %v1077_v28  ;;  %v604_v48 = vpack.c.bf16 %v582_v24, %v580_v30  ;;  %v333_v54 = vmul.f32 0.5, %v1380_v33  ;;  %v328_v26 = vmul.f32 0.5, %v1338_v47 }
 0x15a   :  { %v586_v43 = vmul.f32 %v554_v32, %v330_v1  ;;  %v339_v50 = vmul.f32 0.5, %v1432_v25  ;;  %v334_v27 = vmul.f32 0.5, %v1384_v57  ;;  %v556_v20 = vadd.f32 1.0, %v1073_v49  ;;  %p1155_p4 = por %p1154_p3, %p1153_p2 }
 0x15b   :  { %v1079_v42 = vpop.eup %1078  ;;  %812 = vmatmul.mubr.bf16.gmra.mxu1 %v604_v48  ;;  %v591_v63 = vmul.f32 %v559_v38, %v335_v37  ;;  %v589_v0 = vmul.f32 %v557_v59, %v333_v54  ;;  %v584_v17 = vmul.f32 %v552_v61, %v328_v26  ;;  %v337_v33 = vmul.f32 0.5, %v1418_v23 }
 0x15c   :  { %819 = vmatprep.mubr.bf16.mxu1 %v607_v31  ;;  %v558_v46 = vadd.f32 1.0, %v1079_v42  ;;  %v332_v52 = vmul.f32 0.5, %v1375_v51  ;;  %v338_v55 = vmul.f32 0.5, %v1422_v2  ;;  %v336_v57 = vmul.f32 0.5, %v1410_v34  ;;  %p1156_p5 = pnand %p1155_p4, %p1149_p1 }
 0x15d   :  { %v609_v15 = vpack.c.bf16 %v591_v63, %v589_v0  ;;  %v606_v36 = vpack.c.bf16 %v586_v43, %v584_v17 }
 0x15e   :  { %v1081_v8 = vpop.eup %1080  ;;  %v590_v44 = vmul.f32 %v558_v46, %v334_v27  ;;  %v588_v41 = vmul.f32 %v556_v20, %v332_v52 }
 0x15f   :  { %v561_v9 = vadd.f32 1.0, %v1081_v8 }
 0x160   :  { %v608_v3 = vpack.c.bf16 %v590_v44, %v588_v41 }
 0x161   :  { %v593_v35 = vmul.f32 %v561_v9, %v337_v33 }
 0x162   :  { %v1083_v29 = vpop.eup %1082 }
 0x163   :  { %v563_v5 = vadd.f32 1.0, %v1083_v29  ;;  %820 = vmatmul.mubr.bf16.gmra.mxu1 %v606_v36 }
 0x164   :  { %827 = vmatprep.mubr.bf16.mxu1 %v609_v15  ;;  %v1085_v45 = vpop.eup %1084 }
 0x165   :  { %v595_v47 = vmul.f32 %v563_v5, %v339_v50  ;;  %v1087_v60 = vpop.eup %1086  ;;  %v562_v25 = vadd.f32 1.0, %v1085_v45 }
 0x166   :  { %v560_v4 = vadd.f32 1.0, %v1087_v60 }
 0x167   :  { %v611_v7 = vpack.c.bf16 %v595_v47, %v593_v35  ;;  %v594_v49 = vmul.f32 %v562_v25, %v338_v55 }
 0x168   :  { %v592_v23 = vmul.f32 %v560_v4, %v336_v57 }
 0x16a   :  { %v610_v58 = vpack.c.bf16 %v594_v49, %v592_v23 }
 0x16b   :  { %828 = vmatmul.mubr.bf16.gmra.mxu1 %v608_v3 }
 0x16c   :  { %835 = vmatprep.mubr.bf16.mxu1 %v611_v7 }
 0x173   :  { %836 = vmatmul.mubr.bf16.gmra.mxu1 %v610_v58 }
 0x1f1   :  { %v927_v51 = vpop.f32.mrf.mxu1 }
 0x1f3   :  { %v928_v10 = vpop.f32.mrf.mxu1 }
 0x1f4   :  { %v929_v14 = vadd.f32 %v928_v10, %v927_v51 }
 0x1f5   :  { %v930_v53 = vpop.f32.mrf.mxu1 }
 0x1f6   :  { %v782_v11 = vadd.f32 %v929_v14, %v1470_v6 }
 0x1f7   :  { %v931_v2 = vpop.f32.mrf.mxu1 }
 0x1f8   :  { %844 = vst [vmem:[#allocation8] sm:$0xff] %v782_v11  ;;  %v932_v12 = vadd.f32 %v931_v2, %v930_v53 }
 0x1fa   :  { %v785_v34 = vadd.f32 %v932_v12, %v1470_v6 }
 0x1fc   :  { %845 = vst [vmem:[#allocation8 + $0x8] sm:$0xff] %v785_v34 }
 0x1fe   :  { %v933_v39 = vpop.f32.mrf.mxu1 }
 0x200   :  { %v934_v21 = vpop.f32.mrf.mxu1 }
 0x201   :  { %v935_v13 = vadd.f32 %v934_v21, %v933_v39 }
 0x202   :  { %v936_v16 = vpop.f32.mrf.mxu1 }
 0x203   :  { %v790_v18 = vadd.f32 %v935_v13, %v1470_v6 }
 0x204   :  { %v937_v19 = vpop.f32.mrf.mxu1 }
 0x205   :  { %846 = vst [vmem:[#allocation8 + $0x10] sm:$0xff] %v790_v18  ;;  %v938_v62 = vadd.f32 %v937_v19, %v936_v16 }
 0x207   :  { %v793_v24 = vadd.f32 %v938_v62, %v1470_v6 }
 0x209   :  { %847 = vst [vmem:[#allocation8 + $0x18] sm:$0xff] %v793_v24  ;;  %v939_v22 = vpop.f32.mrf.mxu1 }
 0x20b   :  { %v940_v56 = vpop.f32.mrf.mxu1 }
 0x20c   :  { %v941_v28 = vadd.f32 %v940_v56, %v939_v22 }
 0x20d   :  { %v942_v40 = vpop.f32.mrf.mxu1 }
 0x20e   :  { %v798_v30 = vadd.f32 %v941_v28, %v1470_v6 }
 0x20f   :  { %v943_v31 = vpop.f32.mrf.mxu1 }
 0x210   :  { %848 = vst [vmem:[#allocation8 + $0x20] sm:$0xff] %v798_v30  ;;  %v944_v38 = vadd.f32 %v943_v31, %v942_v40 }
 0x212   :  { %v801_v48 = vadd.f32 %v944_v38, %v1470_v6 }
 0x213   :  { %v945_v32 = vpop.f32.mrf.mxu1 }
 0x214   :  { %849 = vst [vmem:[#allocation8 + $0x28] sm:$0xff] %v801_v48 }
 0x215   :  { %v946_v37 = vpop.f32.mrf.mxu1 }
 0x216   :  { %v947_v59 = vadd.f32 %v946_v37, %v945_v32 }
 0x217   :  { %v948_v42 = vpop.f32.mrf.mxu1 }
 0x218   :  { %v806_v1 = vadd.f32 %v947_v59, %v1470_v6 }
 0x219   :  { %v949_v61 = vpop.f32.mrf.mxu1 }
 0x21a   :  { %850 = vst [vmem:[#allocation8 + $0x30] sm:$0xff] %v806_v1  ;;  %v950_v54 = vadd.f32 %v949_v61, %v948_v42 }
 0x21b   :  { %v951_v63 = vpop.f32.mrf.mxu1 }
 0x21c   :  { %v809_v26 = vadd.f32 %v950_v54, %v1470_v6 }
 0x21d   :  { %v952_v43 = vpop.f32.mrf.mxu1 }
 0x21e   :  { %851 = vst [vmem:[#allocation8 + $0x38] sm:$0xff] %v809_v26  ;;  %v953_v8 = vadd.f32 %v952_v43, %v951_v63 }
 0x21f   :  { %v954_v0 = vpop.f32.mrf.mxu1 }
 0x220   :  { %v814_v17 = vadd.f32 %v953_v8, %v1470_v6 }
 0x221   :  { %v955_v15 = vpop.f32.mrf.mxu1 }
 0x222   :  { %852 = vst [vmem:[#allocation8 + $0x40] sm:$0xff] %v814_v17  ;;  %v956_v29 = vadd.f32 %v955_v15, %v954_v0 }
 0x223   :  { %v957_v36 = vpop.f32.mrf.mxu1 }
 0x224   :  { %v817_v46 = vadd.f32 %v956_v29, %v1470_v6 }
 0x225   :  { %v958_v50 = vpop.f32.mrf.mxu1 }
 0x226   :  { %853 = vst [vmem:[#allocation8 + $0x48] sm:$0xff] %v817_v46  ;;  %v959_v9 = vadd.f32 %v958_v50, %v957_v36 }
 0x227   :  { %v960_v5 = vpop.f32.mrf.mxu1 }
 0x228   :  { %v822_v27 = vadd.f32 %v959_v9, %v1470_v6 }
 0x229   :  { %v961_v20 = vpop.f32.mrf.mxu1 }
 0x22a   :  { %854 = vst [vmem:[#allocation8 + $0x50] sm:$0xff] %v822_v27  ;;  %v962_v33 = vadd.f32 %v961_v20, %v960_v5 }
 0x22b   :  { %v963_v47 = vpop.f32.mrf.mxu1 }
 0x22c   :  { %v825_v52 = vadd.f32 %v962_v33, %v1470_v6 }
 0x22d   :  { %v964_v44 = vpop.f32.mrf.mxu1 }
 0x22e   :  { %855 = vst [vmem:[#allocation8 + $0x58] sm:$0xff] %v825_v52  ;;  %v965_v45 = vadd.f32 %v964_v44, %v963_v47 }
 0x22f   :  { %v966_v35 = vpop.f32.mrf.mxu1 }
 0x230   :  { %v830_v41 = vadd.f32 %v965_v45, %v1470_v6 }
 0x231   :  { %v967_v60 = vpop.f32.mrf.mxu1 }
 0x232   :  { %856 = vst [vmem:[#allocation8 + $0x60] sm:$0xff] %v830_v41  ;;  %v968_v7 = vadd.f32 %v967_v60, %v966_v35 }
 0x233   :  { %v969_v3 = vpop.f32.mrf.mxu1 }
 0x234   :  { %v833_v25 = vadd.f32 %v968_v7, %v1470_v6 }
 0x235   :  { %v970_v55 = vpop.f32.mrf.mxu1 }
 0x236   :  { %857 = vst [vmem:[#allocation8 + $0x68] sm:$0xff] %v833_v25  ;;  %v971_v4 = vadd.f32 %v970_v55, %v969_v3 }
 0x237   :  { %v972_v57 = vpop.f32.mrf.mxu1 }
 0x238   :  { %v838_v49 = vadd.f32 %v971_v4, %v1470_v6 }
 0x239   :  { %v973_v23 = vpop.f32.mrf.mxu1 }
 0x23a   :  { %858 = vst [vmem:[#allocation8 + $0x70] sm:$0xff] %v838_v49  ;;  %v974_v58 = vadd.f32 %v973_v23, %v972_v57 }
 0x23c   :  { %v841_v51 = vadd.f32 %v974_v58, %v1470_v6 }
 0x23e   :  { %859 = vst [vmem:[#allocation8 + $0x78] sm:$0xff] %v841_v51 }
 0x23f   :  { %1159 = shalt.err (!%p1156_p5)
}
 0x240   :  { %871 = dma.vmem_to_hbm [thread:$0]  %s866_s12, 2048, %s1499_s5, [#allocation4], %s1176_s23, %s1176_s23, %s1177_s24  }
 0x241   :  { %1172 = dma.done.wait [#allocation4], 2048  }
 0x242   :  { %1173 = vsyncadd [#allocation4], 4294965248 }
 0x243   :  { %875 = vsyncpa [#allocation3], 1 }
 0x244   :  { %876 = vsyncpa [#allocation6], 1 }
 0x245   :  { %877 = vsyncpa [#allocation4], 1 }

// kernel: tpu_custom_call.1
= control target key start
LH: loop header
LB: loop body
LE: loop exit
PB: predicated region body
PF: predicated region fallthrough
CT: control target
= control target key end

     0   :  { %10 = vsyncpa [#allocation3], 0  ;;  %s1494_s0 = inlined_call_operand.hbm [shape: f32[128,128], index: 0, kind: input, shape index: {}]   ;;  %s1495_s1 = inlined_call_operand.hbm [shape: bf16[128,256], index: 1, kind: input, shape index: {}]   ;;  %s1496_s2 = inlined_call_operand.vmem [shape: f32[1,256], index: 2, kind: input, shape index: {}]   ;;  %s1497_s3 = inlined_call_operand.hbm [shape: bf16[256,128], index: 3, kind: input, shape index: {}]   ;;  %s1498_s4 = inlined_call_operand.vmem [shape: f32[1,128], index: 4, kind: input, shape index: {}]   ;;  %s1499_s5 = inlined_call_operand.hbm [shape: f32[128,128], index: 5, kind: output, shape index: {}]  }
   0x1   :  { %11 = vsyncpa [#allocation6], 0 }
   0x2   :  { %12 = vsyncpa [#allocation4], 0  ;;  %s1174_s18 = smov [#allocation5]   ;;  %s1175_s20 = smov [#allocation2]  }
   0x3   :  { %s30_s19 = sshll.u32 %s1174_s18, 4  ;;  %s18_s21 = sshll.u32 %s1175_s20, 4  ;;  %s31_s19 = int_to_ptr.vmem [resolvable:$true] %s30_s19  ;;  %s19_s21 = int_to_ptr.vmem [resolvable:$true] %s18_s21 }
   0x4   :  { %s1096_s22 = scalar_lea.vmem %s31_s19, 2048  ;;  %p1101_p1 = scmp.lt.s32.totalorder %s31_s19, %s31_s19 }
   0x5   :  { %p1097_p0 = scmp.ne.s32.totalorder %s31_s19, %s1096_s22  ;;  %p1102_p2 = scmp.lt.s32.totalorder %s1096_s22, %s1096_s22 }
   0x7   :  { %p1103_p3 = por %p1102_p2, %p1101_p1 }
   0x9   :  { %p1104_p4 = pnand %p1103_p3, %p1097_p0 }
   0xb   :  { %1107 = shalt.err (!%p1104_p4)
}
   0xc   :  { %s1176_s23 = smov 128   ;;  %s1177_s24 = smov 8  }
   0xd   :  { %36 = dma.hbm_to_vmem [thread:$0]  %s1495_s1, 2048, %s31_s19, [#allocation6], %s1176_s23, %s1176_s23, %s1177_s24  }
   0xe   :  { %s1116_s27 = scalar_lea.vmem %s19_s21, 2048  ;;  %p1121_p6 = scmp.lt.s32.totalorder %s19_s21, %s19_s21 }
   0xf   :  { %p1117_p5 = scmp.ne.s32.totalorder %s19_s21, %s1116_s27  ;;  %p1122_p7 = scmp.lt.s32.totalorder %s1116_s27, %s1116_s27 }
  0x11   :  { %p1123_p8 = por %p1122_p7, %p1121_p6 }
  0x13   :  { %p1124_p9 = pnand %p1123_p8, %p1117_p5 }
  0x15   :  { %1127 = shalt.err (!%p1124_p9)
}
  0x16   :  { %24 = dma.hbm_to_vmem [thread:$0]  %s1494_s0, 2048, %s19_s21, [#allocation3], %s1176_s23, %s1176_s23, %s1177_s24  }
  0x17   :  { %s1178_s30 = smov [#allocation7]  }
  0x18   :  { %s44_s6 = sshll.u32 %s1178_s30, 4  ;;  %s45_s6 = int_to_ptr.vmem [resolvable:$true] %s44_s6 }
  0x19   :  { %s1136_s7 = scalar_lea.vmem %s45_s6, 2048  ;;  %p1141_p11 = scmp.lt.s32.totalorder %s45_s6, %s45_s6 }
  0x1a   :  { %p1137_p10 = scmp.ne.s32.totalorder %s45_s6, %s1136_s7  ;;  %p1142_p12 = scmp.lt.s32.totalorder %s1136_s7, %s1136_s7 }
  0x1c   :  { %p1143_p13 = por %p1142_p12, %p1141_p11 }
  0x1e   :  { %p1144_p0 = pnand %p1143_p13, %p1137_p10 }
  0x20   :  { %1147 = shalt.err (!%p1144_p0)
}
  0x21   :  { %s1179_s1 = smov 64   ;;  %s1180_s8 = smov 4  }
  0x22   :  { %50 = dma.hbm_to_vmem [thread:$0]  %s1497_s3, 2048, %s45_s6, [#allocation6], %s1179_s1, %s1179_s1, %s1180_s8  }
  0x23   :  { %1168 = dma.done.wait [#allocation3], 2048  }
  0x24   :  { %1169 = vsyncadd [#allocation3], 4294965248 }
  0x25   :  { %1170 = dma.done.wait [#allocation6], 4096  }
  0x26   :  { %1171 = vsyncadd [#allocation6], 4294963200  ;;  %v1181_v0 = vmov 0   ;;  %v984_v1 = vld [vmem:[#allocation5 + $0x74] ss:$8 sps:$4 sm:$0xff]   ;;  %v63_v17 = vld [vmem:[#allocation2] sm:$0xff]  ;;  %v105_v57 = vlaneseq }
  0x27   :  { %227 = vmatprep.mubr.bf16.mxu0 %v1181_v0  ;;  %v986_v2 = vld [vmem:[#allocation5 + $0x70] ss:$8 sps:$4 sm:$0xff]   ;;  %195 = vmatprep.subr.bf16.mxu0 %v984_v1  ;;  %v987_v3 = vld [vmem:[#allocation5 + $0x64] ss:$8 sps:$4 sm:$0xff]   ;;  %v989_v4 = vld [vmem:[#allocation5 + $0x60] ss:$8 sps:$4 sm:$0xff]  }
  0x28   :  { %196 = vmatpush1.bf16.msra.mxu0 %v986_v2  ;;  %v990_v5 = vld [vmem:[#allocation5 + $0x54] ss:$8 sps:$4 sm:$0xff]   ;;  %v992_v6 = vld [vmem:[#allocation5 + $0x50] ss:$8 sps:$4 sm:$0xff]   ;;  %v993_v7 = vld [vmem:[#allocation5 + $0x44] ss:$8 sps:$4 sm:$0xff]  }
  0x29   :  { %197 = vmatprep.subr.bf16.mxu0 %v987_v3  ;;  %v995_v8 = vld [vmem:[#allocation5 + $0x40] ss:$8 sps:$4 sm:$0xff]   ;;  %v996_v9 = vld [vmem:[#allocation5 + $0x34] ss:$8 sps:$4 sm:$0xff]   ;;  %v998_v10 = vld [vmem:[#allocation5 + $0x30] ss:$8 sps:$4 sm:$0xff]  }
  0x2a   :  { %v999_v11 = vld [vmem:[#allocation5 + $0x24] ss:$8 sps:$4 sm:$0xff]   ;;  %v1001_v12 = vld [vmem:[#allocation5 + $0x20] ss:$8 sps:$4 sm:$0xff]   ;;  %v1002_v13 = vld [vmem:[#allocation5 + $0x14] ss:$8 sps:$4 sm:$0xff]  }
  0x2b   :  { %v1004_v14 = vld [vmem:[#allocation5 + $0x10] ss:$8 sps:$4 sm:$0xff]   ;;  %v1005_v15 = vld [vmem:[#allocation5 + $0x4] ss:$8 sps:$4 sm:$0xff]   ;;  %v1007_v16 = vld [vmem:[#allocation5] ss:$8 sps:$4 sm:$0xff]  }
  0x2c   :  { %198 = vmatpush1.bf16.msra.mxu0 %v989_v4  ;;  %v64_v18 = vld [vmem:[#allocation2 + $0x8] sm:$0xff]  ;;  %v65_v20 = vld [vmem:[#allocation2 + $0x10] sm:$0xff]  ;;  %v66_v21 = vld [vmem:[#allocation2 + $0x18] sm:$0xff]  ;;  %v106_v58 = vshrl.u32 %v105_v57, 7 }
  0x2d   :  { %199 = vmatprep.subr.bf16.mxu0 %v990_v5  ;;  %v79_v19 = vpack.c.bf16 %v64_v18, %v63_v17  ;;  %v80_v22 = vpack.c.bf16 %v66_v21, %v65_v20  ;;  %v67_v23 = vld [vmem:[#allocation2 + $0x20] sm:$0xff]  ;;  %v68_v24 = vld [vmem:[#allocation2 + $0x28] sm:$0xff]  ;;  %v69_v26 = vld [vmem:[#allocation2 + $0x30] sm:$0xff] }
  0x2e   :  { %v81_v25 = vpack.c.bf16 %v68_v24, %v67_v23  ;;  %v70_v27 = vld [vmem:[#allocation2 + $0x38] sm:$0xff]  ;;  %v71_v29 = vld [vmem:[#allocation2 + $0x40] sm:$0xff]  ;;  %v72_v30 = vld [vmem:[#allocation2 + $0x48] sm:$0xff]  ;;  %v107_v59 = vsub.s32 0, %v106_v58  ;;  %v111_v61 = vsub.s32 1, %v106_v58 }
  0x2f   :  { %v82_v28 = vpack.c.bf16 %v70_v27, %v69_v26  ;;  %v83_v31 = vpack.c.bf16 %v72_v30, %v71_v29  ;;  %v73_v32 = vld [vmem:[#allocation2 + $0x50] sm:$0xff]  ;;  %v74_v33 = vld [vmem:[#allocation2 + $0x58] sm:$0xff]  ;;  %v75_v35 = vld [vmem:[#allocation2 + $0x60] sm:$0xff] }
  0x30   :  { %200 = vmatpush1.bf16.msra.mxu0 %v992_v6  ;;  %v84_v34 = vpack.c.bf16 %v74_v33, %v73_v32  ;;  %v76_v36 = vld [vmem:[#allocation2 + $0x68] sm:$0xff]  ;;  %v77_v38 = vld [vmem:[#allocation2 + $0x70] sm:$0xff]  ;;  %v78_v39 = vld [vmem:[#allocation2 + $0x78] sm:$0xff] }
  0x31   :  { %201 = vmatprep.subr.bf16.mxu0 %v993_v7  ;;  %v85_v37 = vpack.c.bf16 %v76_v36, %v75_v35  ;;  %v86_v40 = vpack.c.bf16 %v78_v39, %v77_v38  ;;  %v1008_v41 = vld [vmem:[#allocation7 + $0x78] sm:$0xff]   ;;  %v1010_v43 = vld [vmem:[#allocation7 + $0x70] sm:$0xff]   ;;  %v1012_v45 = vld [vmem:[#allocation7 + $0x68] sm:$0xff]  }
  0x32   :  { %v1009_v42 = vld [vmem:[#allocation7 + $0x38] sm:$0xff]   ;;  %911 = vmatprep.subr.bf16.mxu1 %v1008_v41  ;;  %v1011_v44 = vld [vmem:[#allocation7 + $0x30] sm:$0xff]   ;;  %v1013_v46 = vld [vmem:[#allocation7 + $0x28] sm:$0xff]  }
  0x33   :  { %912 = vmatpush3.bf16.msra.mxu1 %v1009_v42  ;;  %v1014_v47 = vld [vmem:[#allocation7 + $0x60] sm:$0xff]   ;;  %v1016_v49 = vld [vmem:[#allocation7 + $0x58] sm:$0xff]   ;;  %v1018_v51 = vld [vmem:[#allocation7 + $0x50] sm:$0xff]  }
  0x34   :  { %202 = vmatpush1.bf16.msra.mxu0 %v995_v8  ;;  %913 = vmatprep.subr.bf16.mxu1 %v1010_v43  ;;  %v1015_v48 = vld [vmem:[#allocation7 + $0x20] sm:$0xff]   ;;  %v1017_v50 = vld [vmem:[#allocation7 + $0x18] sm:$0xff]   ;;  %v1019_v52 = vld [vmem:[#allocation7 + $0x10] sm:$0xff]  }
  0x35   :  { %203 = vmatprep.subr.bf16.mxu0 %v996_v9  ;;  %v1020_v53 = vld [vmem:[#allocation7 + $0x48] sm:$0xff]   ;;  %v1022_v55 = vld [vmem:[#allocation7 + $0x40] sm:$0xff]  }
  0x36   :  { %v1021_v54 = vld [vmem:[#allocation7 + $0x8] sm:$0xff]   ;;  %v1023_v56 = vld [vmem:[#allocation7] sm:$0xff]  }
  0x37   :  { %914 = vmatpush3.bf16.msra.mxu1 %v1011_v44  ;;  %v103_v60 = vld [vmem:[%s1496_s2] sm:$0x3] }
  0x38   :  { %204 = vmatpush1.bf16.msra.mxu0 %v998_v10  ;;  %915 = vmatprep.subr.bf16.mxu1 %v1012_v45  ;;  %v1239_v62 = vrot.slane %v103_v60, %v107_v59  ;;  %v1241_v63 = vrot.slane %v103_v60, %v111_v61 }
  0x39   :  { %205 = vmatprep.subr.bf16.mxu0 %v999_v11 }
  0x3b   :  { %916 = vmatpush3.bf16.msra.mxu1 %v1013_v46 }
  0x3c   :  { %206 = vmatpush1.bf16.msra.mxu0 %v1001_v12  ;;  %917 = vmatprep.subr.bf16.mxu1 %v1014_v47 }
  0x3d   :  { %207 = vmatprep.subr.bf16.mxu0 %v1002_v13 }
  0x3f   :  { %918 = vmatpush3.bf16.msra.mxu1 %v1015_v48 }
  0x40   :  { %208 = vmatpush1.bf16.msra.mxu0 %v1004_v14  ;;  %919 = vmatprep.subr.bf16.mxu1 %v1016_v49 }
  0x41   :  { %209 = vmatprep.subr.bf16.mxu0 %v1005_v15 }
  0x43   :  { %920 = vmatpush3.bf16.msra.mxu1 %v1017_v50 }
  0x44   :  { %210 = vmatpush1.bf16.msra.mxu0 %v1007_v16  ;;  %921 = vmatprep.subr.bf16.mxu1 %v1018_v51 }
  0x47   :  { %228 = vmatmul.mubr.bf16.vlgmr.msra.gmra.mxu0 %v79_v19  ;;  %922 = vmatpush3.bf16.msra.mxu1 %v1019_v52 }
  0x48   :  { %237 = vmatprep.mubr.bf16.mxu0 %v1181_v0  ;;  %923 = vmatprep.subr.bf16.mxu1 %v1020_v53 }
  0x4b   :  { %924 = vmatpush3.bf16.msra.mxu1 %v1021_v54 }
  0x4c   :  { %925 = vmatprep.subr.bf16.mxu1 %v1022_v55 }
  0x4f   :  { %238 = vmatmul.mubr.bf16.gmra.mxu0 %v80_v22  ;;  %926 = vmatpush3.bf16.msra.mxu1 %v1023_v56 }
  0x50   :  { %247 = vmatprep.mubr.bf16.mxu0 %v1181_v0 }
  0x57   :  { %248 = vmatmul.mubr.bf16.gmra.mxu0 %v81_v25 }
  0x58   :  { %257 = vmatprep.mubr.bf16.mxu0 %v1181_v0 }
  0x5f   :  { %258 = vmatmul.mubr.bf16.gmra.mxu0 %v82_v28 }
  0x60   :  { %267 = vmatprep.mubr.bf16.mxu0 %v1181_v0 }
  0x67   :  { %268 = vmatmul.mubr.bf16.gmra.mxu0 %v83_v31 }
  0x68   :  { %277 = vmatprep.mubr.bf16.mxu0 %v1181_v0 }
  0x6f   :  { %278 = vmatmul.mubr.bf16.gmra.mxu0 %v84_v34 }
  0x70   :  { %287 = vmatprep.mubr.bf16.mxu0 %v1181_v0 }
  0x77   :  { %288 = vmatmul.mubr.bf16.gmra.mxu0 %v85_v37 }
  0x78   :  { %297 = vmatprep.mubr.bf16.mxu0 %v1181_v0 }
  0x7f   :  { %298 = vmatmul.mubr.bf16.gmra.mxu0 %v86_v40 }
 0x107   :  { %v229_v0 = vpop.f32.mrf.mxu0 }
 0x108   :  { %v230_v1 = vadd.f32 %v229_v0, %v1239_v62 }
 0x109   :  { %v231_v2 = vpop.f32.mrf.mxu0 }
 0x10a   :  { %v372_v3 = vmul.f32 0.044715, %v230_v1  ;;  %v232_v4 = vadd.f32 %v231_v2, %v1241_v63  ;;  %v340_v10 = vmul.f32 0.7978846, %v230_v1  ;;  %v1250_v33 = vmul.f32 0.5, %v230_v1 }
 0x10b   :  { %v233_v5 = vpop.f32.mrf.mxu0 }
 0x10c   :  { %v404_v6 = vmul.f32 %v372_v3, %v230_v1  ;;  %v373_v7 = vmul.f32 0.044715, %v232_v4  ;;  %v234_v8 = vadd.f32 %v233_v5, %v1239_v62  ;;  %v341_v20 = vmul.f32 0.7978846, %v232_v4 }
 0x10d   :  { %v235_v9 = vpop.f32.mrf.mxu0  ;;  %v1252_v38 = vmul.f32 0.5, %v232_v4 }
 0x10e   :  { %v436_v11 = vadd.f32 1.0, %v404_v6  ;;  %v405_v12 = vmul.f32 %v373_v7, %v232_v4  ;;  %v374_v13 = vmul.f32 0.044715, %v234_v8  ;;  %v236_v14 = vadd.f32 %v235_v9, %v1241_v63 }
 0x10f   :  { %v239_v15 = vpop.f32.mrf.mxu0  ;;  %v342_v23 = vmul.f32 0.7978846, %v234_v8  ;;  %v1258_v49 = vmul.f32 0.5, %v234_v8 }
 0x110   :  { %v468_v16 = vmul.f32 %v436_v11, %v340_v10  ;;  %v437_v17 = vadd.f32 1.0, %v405_v12  ;;  %v406_v18 = vmul.f32 %v374_v13, %v234_v8  ;;  %v240_v19 = vadd.f32 %v239_v15, %v1239_v62 }
 0x111   :  { %v375_v21 = vmul.f32 0.044715, %v236_v14  ;;  %v241_v22 = vpop.f32.mrf.mxu0  ;;  %v343_v34 = vmul.f32 0.7978846, %v236_v14  ;;  %v1256_v48 = vmul.f32 0.5, %v236_v14 }
 0x112   :  { %v438_v24 = vadd.f32 1.0, %v406_v18  ;;  %v376_v25 = vmul.f32 0.044715, %v240_v19  ;;  %1024 = vtanh.f32 %v468_v16  ;;  %v242_v27 = vadd.f32 %v241_v22, %v1241_v63 }
 0x113   :  { %v407_v26 = vmul.f32 %v375_v21, %v236_v14  ;;  %v243_v28 = vpop.f32.mrf.mxu0  ;;  %v469_v29 = vmul.f32 %v437_v17, %v341_v20  ;;  %v344_v39 = vmul.f32 0.7978846, %v240_v19  ;;  %v1260_v57 = vmul.f32 0.5, %v240_v19 }
 0x114   :  { %v470_v30 = vmul.f32 %v438_v24, %v342_v23  ;;  %v408_v31 = vmul.f32 %v376_v25, %v240_v19  ;;  %v244_v32 = vadd.f32 %v243_v28, %v1239_v62  ;;  %v377_v36 = vmul.f32 0.044715, %v242_v27 }
 0x115   :  { %v439_v35 = vadd.f32 1.0, %v407_v26  ;;  %v245_v37 = vpop.f32.mrf.mxu0  ;;  %1026 = vtanh.f32 %v469_v29  ;;  %v345_v54 = vmul.f32 0.7978846, %v242_v27  ;;  %v1265_v0 = vmul.f32 0.5, %v242_v27 }
 0x116   :  { %v440_v40 = vadd.f32 1.0, %v408_v31  ;;  %v378_v41 = vmul.f32 0.044715, %v244_v32  ;;  %1028 = vtanh.f32 %v470_v30  ;;  %v409_v42 = vmul.f32 %v377_v36, %v242_v27 }
 0x117   :  { %v246_v43 = vadd.f32 %v245_v37, %v1241_v63  ;;  %v249_v44 = vpop.f32.mrf.mxu0  ;;  %v471_v45 = vmul.f32 %v439_v35, %v343_v34  ;;  %v346_v58 = vmul.f32 0.7978846, %v244_v32  ;;  %v1270_v4 = vmul.f32 0.5, %v244_v32 }
 0x118   :  { %v410_v46 = vmul.f32 %v378_v41, %v244_v32  ;;  %v250_v47 = vadd.f32 %v249_v44, %v1239_v62  ;;  %v472_v50 = vmul.f32 %v440_v40, %v344_v39  ;;  %v441_v51 = vadd.f32 1.0, %v409_v42 }
 0x119   :  { %v379_v52 = vmul.f32 0.044715, %v246_v43  ;;  %v251_v53 = vpop.f32.mrf.mxu0  ;;  %1030 = vtanh.f32 %v471_v45  ;;  %v347_v5 = vmul.f32 0.7978846, %v246_v43  ;;  %v1278_v17 = vmul.f32 0.5, %v246_v43 }
 0x11a   :  { %v442_v55 = vadd.f32 1.0, %v410_v46  ;;  %v380_v56 = vmul.f32 0.044715, %v250_v47  ;;  %v1263_v60 = vadd.f32 %v251_v53, %v1241_v63  ;;  %v473_v1 = vmul.f32 %v441_v51, %v345_v54 }
 0x11b   :  { %v411_v59 = vmul.f32 %v379_v52, %v246_v43  ;;  %v253_v61 = vpop.f32.mrf.mxu0  ;;  %1032 = vtanh.f32 %v472_v50  ;;  %v348_v10 = vmul.f32 0.7978846, %v250_v47  ;;  %v1284_v21 = vmul.f32 0.5, %v250_v47 }
 0x11c   :  { %v412_v2 = vmul.f32 %v380_v56, %v250_v47  ;;  %v1268_v3 = vadd.f32 %v253_v61, %v1239_v62  ;;  %v381_v7 = vmul.f32 0.044715, %v1263_v60  ;;  %v474_v9 = vmul.f32 %v442_v55, %v346_v58 }
 0x11d   :  { %v443_v6 = vadd.f32 1.0, %v411_v59  ;;  %v255_v8 = vpop.f32.mrf.mxu0  ;;  %1034 = vtanh.f32 %v473_v1  ;;  %v349_v23 = vmul.f32 0.7978846, %v1263_v60 }
 0x11e   :  { %v444_v11 = vadd.f32 1.0, %v412_v2  ;;  %v382_v12 = vmul.f32 0.044715, %v1268_v3  ;;  %v413_v14 = vmul.f32 %v381_v7, %v1263_v60  ;;  %v1276_v15 = vadd.f32 %v255_v8, %v1241_v63 }
 0x11f   :  { %v475_v13 = vmul.f32 %v443_v6, %v347_v5  ;;  %v259_v16 = vpop.f32.mrf.mxu0  ;;  %v1025_v18 = vpop.eup %1024  ;;  %1036 = vtanh.f32 %v474_v9  ;;  %v350_v27 = vmul.f32 0.7978846, %v1268_v3 }
 0x120   :  { %v414_v19 = vmul.f32 %v382_v12, %v1268_v3  ;;  %v1282_v20 = vadd.f32 %v259_v16, %v1239_v62  ;;  %v476_v22 = vmul.f32 %v444_v11, %v348_v10  ;;  %v445_v24 = vadd.f32 1.0, %v413_v14 }
 0x121   :  { %v383_v25 = vmul.f32 0.044715, %v1276_v15  ;;  %v261_v26 = vpop.f32.mrf.mxu0  ;;  %1038 = vtanh.f32 %v475_v13  ;;  %v532_v35 = vadd.f32 1.0, %v1025_v18  ;;  %v351_v39 = vmul.f32 0.7978846, %v1276_v15 }
 0x122   :  { %v446_v28 = vadd.f32 1.0, %v414_v19  ;;  %v384_v29 = vmul.f32 0.044715, %v1282_v20  ;;  %v1027_v30 = vpop.eup %1026  ;;  %v1292_v32 = vadd.f32 %v261_v26, %v1241_v63  ;;  %v477_v37 = vmul.f32 %v445_v24, %v349_v23 }
 0x123   :  { %v415_v31 = vmul.f32 %v383_v25, %v1276_v15  ;;  %v263_v34 = vpop.f32.mrf.mxu0  ;;  %v1029_v36 = vpop.eup %1028  ;;  %1040 = vtanh.f32 %v476_v22  ;;  %v352_v43 = vmul.f32 0.7978846, %v1282_v20  ;;  %v533_v52 = vadd.f32 1.0, %v1027_v30 }
 0x124   :  { %v416_v40 = vmul.f32 %v384_v29, %v1282_v20  ;;  %v1297_v41 = vadd.f32 %v263_v34, %v1239_v62  ;;  %v385_v44 = vmul.f32 0.044715, %v1292_v32  ;;  %v478_v47 = vmul.f32 %v446_v28, %v350_v27 }
 0x125   :  { %v447_v42 = vadd.f32 1.0, %v415_v31  ;;  %v265_v45 = vpop.f32.mrf.mxu0  ;;  %v534_v58 = vadd.f32 1.0, %v1029_v36  ;;  %1042 = vtanh.f32 %v477_v37  ;;  %v353_v5 = vmul.f32 0.7978846, %v1292_v32 }
 0x126   :  { %v1031_v46 = vpop.eup %1030  ;;  %v448_v50 = vadd.f32 1.0, %v416_v40  ;;  %v386_v51 = vmul.f32 0.044715, %v1297_v41  ;;  %v417_v53 = vmul.f32 %v385_v44, %v1292_v32  ;;  %v1304_v54 = vadd.f32 %v265_v45, %v1241_v63 }
 0x127   :  { %v269_v55 = vpop.f32.mrf.mxu0  ;;  %v535_v56 = vadd.f32 1.0, %v1031_v46  ;;  %v479_v59 = vmul.f32 %v447_v42, %v351_v39  ;;  %1044 = vtanh.f32 %v478_v47  ;;  %v354_v10 = vmul.f32 0.7978846, %v1297_v41 }
 0x128   :  { %v418_v61 = vmul.f32 %v386_v51, %v1297_v41  ;;  %v1308_v1 = vadd.f32 %v269_v55, %v1239_v62  ;;  %v480_v2 = vmul.f32 %v448_v50, %v352_v43  ;;  %v449_v6 = vadd.f32 1.0, %v417_v53  ;;  %v1312_v9 = vpop.eup %1032 }
 0x129   :  { %v387_v7 = vmul.f32 0.044715, %v1304_v54  ;;  %v271_v8 = vpop.f32.mrf.mxu0  ;;  %v565_v18 = vmul.f32 %v533_v52, %v1252_v38  ;;  %v567_v19 = vmul.f32 %v535_v56, %v1256_v48  ;;  %1046 = vtanh.f32 %v479_v59 }
 0x12a   :  { %v450_v11 = vadd.f32 1.0, %v418_v61  ;;  %v388_v12 = vmul.f32 0.044715, %v1308_v1  ;;  %v1318_v14 = vadd.f32 %v271_v8, %v1241_v63  ;;  %v355_v22 = vmul.f32 0.7978846, %v1304_v54  ;;  %v1035_v25 = vpop.eup %1034 }
 0x12b   :  { %v419_v13 = vmul.f32 %v387_v7, %v1304_v54  ;;  %v273_v16 = vpop.f32.mrf.mxu0  ;;  %1048 = vtanh.f32 %v480_v2  ;;  %v481_v26 = vmul.f32 %v449_v6, %v353_v5  ;;  %v356_v38 = vmul.f32 0.7978846, %v1308_v1 }
 0x12c   :  { %v420_v23 = vmul.f32 %v388_v12, %v1308_v1  ;;  %v1325_v24 = vadd.f32 %v273_v16, %v1239_v62  ;;  %v389_v28 = vmul.f32 0.044715, %v1318_v14  ;;  %v482_v30 = vmul.f32 %v450_v11, %v354_v10  ;;  %v1037_v34 = vpop.eup %1036 }
 0x12d   :  { %v451_v27 = vadd.f32 1.0, %v419_v13  ;;  %v275_v29 = vpop.f32.mrf.mxu0  ;;  %v597_v37 = vpack.c.bf16 %v567_v19, %v565_v18  ;;  %v564_v40 = vmul.f32 %v532_v35, %v1250_v33  ;;  %v566_v46 = vmul.f32 %v534_v58, %v1258_v49 }
 0x12e   :  { %v452_v31 = vadd.f32 1.0, %v420_v23  ;;  %v390_v48 = vmul.f32 0.044715, %v1325_v24  ;;  %v421_v36 = vmul.f32 %v389_v28, %v1318_v14  ;;  %v1332_v39 = vadd.f32 %v275_v29, %v1241_v63  ;;  %v1039_v43 = vpop.eup %1038 }
 0x12f   :  { %v279_v42 = vpop.f32.mrf.mxu0  ;;  %v483_v44 = vmul.f32 %v451_v27, %v355_v22  ;;  %1050 = vtanh.f32 %v481_v26  ;;  %v357_v50 = vmul.f32 0.7978846, %v1318_v14  ;;  %779 = vmatprep.mubr.bf16.mxu1 %v597_v37  ;;  %v596_v56 = vpack.c.bf16 %v566_v46, %v564_v40 }
 0x130   :  { %v422_v45 = vmul.f32 %v390_v48, %v1325_v24  ;;  %v1338_v47 = vadd.f32 %v279_v42, %v1239_v62  ;;  %v453_v51 = vadd.f32 1.0, %v421_v36  ;;  %v391_v52 = vmul.f32 0.044715, %v1332_v39  ;;  %v1342_v55 = vpop.eup %1040 }
 0x131   :  { %v281_v53 = vpop.f32.mrf.mxu0  ;;  %1052 = vtanh.f32 %v482_v30  ;;  %v484_v33 = vmul.f32 %v452_v31, %v356_v38  ;;  %v358_v59 = vmul.f32 0.7978846, %v1325_v24  ;;  %780 = vmatmul.mubr.bf16.vlgmr.msra.gmra.mxu1 %v596_v56  ;;  %v537_v6 = vadd.f32 1.0, %v1035_v25 }
 0x132   :  { %v454_v35 = vadd.f32 1.0, %v422_v45  ;;  %v423_v49 = vmul.f32 %v391_v52, %v1332_v39  ;;  %v392_v58 = vmul.f32 0.044715, %v1338_v47  ;;  %v1348_v61 = vadd.f32 %v281_v53, %v1241_v63  ;;  %v1043_v8 = vpop.eup %1042 }
 0x133   :  { %v283_v2 = vpop.f32.mrf.mxu0  ;;  %1054 = vtanh.f32 %v483_v44  ;;  %v539_v7 = vadd.f32 1.0, %v1039_v43  ;;  %v485_v10 = vmul.f32 %v453_v51, %v357_v50  ;;  %v359_v11 = vmul.f32 0.7978846, %v1332_v39 }
 0x134   :  { %v1351_v5 = vadd.f32 %v283_v2, %v1239_v62  ;;  %v455_v12 = vadd.f32 1.0, %v423_v49  ;;  %v424_v13 = vmul.f32 %v392_v58, %v1338_v47  ;;  %1056 = vtanh.f32 %v484_v33  ;;  %v1357_v23 = vpop.eup %1044 }
 0x135   :  { %v285_v16 = vpop.f32.mrf.mxu0  ;;  %v486_v18 = vmul.f32 %v454_v35, %v358_v59  ;;  %v393_v19 = vmul.f32 0.044715, %v1348_v61  ;;  %v360_v26 = vmul.f32 0.7978846, %v1338_v47  ;;  %v569_v27 = vmul.f32 %v537_v6, %v1265_v0 }
 0x136   :  { %v394_v22 = vmul.f32 0.044715, %v1351_v5  ;;  %v456_v25 = vadd.f32 1.0, %v424_v13  ;;  %v571_v28 = vmul.f32 %v539_v7, %v1278_v17  ;;  %v487_v30 = vmul.f32 %v455_v12, %v359_v11  ;;  %v1047_v36 = vpop.eup %1046 }
 0x137   :  { %v289_v29 = vpop.f32.mrf.mxu0  ;;  %v425_v38 = vmul.f32 %v393_v19, %v1348_v61  ;;  %v1364_v31 = vadd.f32 %v285_v16, %v1241_v63  ;;  %v536_v48 = vadd.f32 1.0, %v1312_v9  ;;  %1058 = vtanh.f32 %v485_v10 }
 0x138   :  { %v426_v37 = vmul.f32 %v394_v22, %v1351_v5  ;;  %v599_v40 = vpack.c.bf16 %v571_v28, %v569_v27  ;;  %v538_v42 = vadd.f32 1.0, %v1037_v34  ;;  %v1368_v44 = vpop.eup %1048  ;;  %1060 = vtanh.f32 %v486_v18 }
 0x139   :  { %v291_v43 = vpop.f32.mrf.mxu0  ;;  %v457_v0 = vadd.f32 1.0, %v425_v38  ;;  %v395_v17 = vmul.f32 0.044715, %v1364_v31  ;;  %v317_v45 = vmul.f32 0.5, %v1263_v60  ;;  %v488_v46 = vmul.f32 %v456_v25, %v360_v26 }
 0x13a   :  { %787 = vmatprep.mubr.bf16.mxu1 %v599_v40  ;;  %v568_v50 = vmul.f32 %v536_v48, %v1260_v57  ;;  %v570_v9 = vmul.f32 %v538_v42, %v1270_v4  ;;  %v1375_v51 = vadd.f32 %v289_v29, %v1239_v62  ;;  %1062 = vtanh.f32 %v487_v30 }
 0x13b   :  { %v293_v52 = vpop.f32.mrf.mxu0  ;;  %v361_v34 = vmul.f32 0.7978846, %v1348_v61  ;;  %v427_v53 = vmul.f32 %v395_v17, %v1364_v31  ;;  %v1380_v33 = vadd.f32 %v291_v43, %v1241_v63  ;;  %v458_v35 = vadd.f32 1.0, %v426_v37 }
 0x13c   :  { %v598_v60 = vpack.c.bf16 %v570_v9, %v568_v50  ;;  %v396_v56 = vmul.f32 0.044715, %v1375_v51  ;;  %v1384_v57 = vadd.f32 %v293_v52, %v1239_v62  ;;  %v1386_v59 = vpop.eup %1050  ;;  %v363_v58 = vmul.f32 0.7978846, %v1364_v31 }
 0x13d   :  { %v295_v4 = vpop.f32.mrf.mxu0  ;;  %v489_v49 = vmul.f32 %v457_v0, %v361_v34  ;;  %v459_v2 = vadd.f32 1.0, %v427_v53  ;;  %v397_v6 = vmul.f32 0.044715, %v1380_v33  ;;  %1064 = vtanh.f32 %v488_v46 }
 0x13e   :  { %v1390_v7 = vpop.eup %1052  ;;  %v362_v10 = vmul.f32 0.7978846, %v1351_v5  ;;  %788 = vmatmul.mubr.bf16.gmra.mxu1 %v598_v60  ;;  %v428_v11 = vmul.f32 %v396_v56, %v1375_v51  ;;  %v398_v12 = vmul.f32 0.044715, %v1384_v57  ;;  %v364_v18 = vmul.f32 0.7978846, %v1375_v51 }
 0x13f   :  { %v299_v13 = vpop.f32.mrf.mxu0  ;;  %v491_v16 = vmul.f32 %v459_v2, %v363_v58  ;;  %v429_v19 = vmul.f32 %v397_v6, %v1380_v33  ;;  %v541_v22 = vadd.f32 1.0, %v1043_v8  ;;  %v319_v27 = vmul.f32 0.5, %v1276_v15 }
 0x140   :  { %v1055_v26 = vpop.eup %1054  ;;  %v460_v25 = vadd.f32 1.0, %v428_v11  ;;  %v543_v28 = vadd.f32 1.0, %v1047_v36  ;;  %v1399_v29 = vadd.f32 %v295_v4, %v1241_v63  ;;  %1066 = vtanh.f32 %v489_v49 }
 0x141   :  { %v301_v30 = vpop.f32.mrf.mxu0  ;;  %v490_v38 = vmul.f32 %v458_v35, %v362_v10  ;;  %v365_v48 = vmul.f32 0.7978846, %v1380_v33  ;;  %v461_v37 = vadd.f32 1.0, %v429_v19  ;;  %v1402_v40 = vpop.eup %1056  ;;  %v430_v43 = vmul.f32 %v398_v12, %v1384_v57 }
 0x142   :  { %v492_v42 = vmul.f32 %v460_v25, %v364_v18  ;;  %v573_v8 = vmul.f32 %v541_v22, %v317_v45  ;;  %v575_v0 = vmul.f32 %v543_v28, %v319_v27  ;;  %v399_v17 = vmul.f32 0.044715, %v1399_v29 }
 0x143   :  { %v318_v15 = vmul.f32 0.5, %v1268_v3  ;;  %v540_v36 = vadd.f32 1.0, %v1342_v55  ;;  %v542_v46 = vadd.f32 1.0, %v1357_v23  ;;  %v303_v50 = vpop.f32.mrf.mxu0  ;;  %1068 = vtanh.f32 %v491_v16 }
 0x144   :  { %v493_v9 = vmul.f32 %v461_v37, %v365_v48  ;;  %v601_v52 = vpack.c.bf16 %v575_v0, %v573_v8  ;;  %v1410_v34 = vadd.f32 %v299_v13, %v1239_v62  ;;  %v1059_v53 = vpop.eup %1058  ;;  %1070 = vtanh.f32 %v490_v38 }
 0x145   :  { %v431_v45 = vmul.f32 %v399_v17, %v1399_v29  ;;  %v572_v35 = vmul.f32 %v540_v36, %v1284_v21  ;;  %v574_v60 = vmul.f32 %v542_v46, %v318_v15  ;;  %v1414_v56 = vpop.eup %1060  ;;  %1072 = vtanh.f32 %v492_v42  ;;  %v305_v6 = vpop.f32.mrf.mxu0 }
 0x146   :  { %v462_v3 = vadd.f32 1.0, %v430_v43  ;;  %795 = vmatprep.mubr.bf16.mxu1 %v601_v52  ;;  %v367_v55 = vmul.f32 0.7978846, %v1399_v29  ;;  %v1418_v23 = vadd.f32 %v301_v30, %v1241_v63  ;;  %v400_v58 = vmul.f32 0.044715, %v1410_v34 }
 0x147   :  { %v463_v4 = vadd.f32 1.0, %v431_v45  ;;  %v600_v49 = vpack.c.bf16 %v574_v60, %v572_v35  ;;  %v1422_v2 = vadd.f32 %v303_v50, %v1239_v62  ;;  %v1063_v21 = vpop.eup %1062  ;;  %1074 = vtanh.f32 %v493_v9 }
 0x148   :  { %v366_v10 = vmul.f32 0.7978846, %v1384_v57  ;;  %v401_v11 = vmul.f32 0.044715, %v1418_v23  ;;  %v321_v16 = vmul.f32 0.5, %v1292_v32  ;;  %v545_v18 = vadd.f32 1.0, %v1386_v59 }
 0x149   :  { %v495_v12 = vmul.f32 %v463_v4, %v367_v55  ;;  %796 = vmatmul.mubr.bf16.gmra.mxu1 %v600_v49  ;;  %v402_v13 = vmul.f32 0.044715, %v1422_v2  ;;  %v323_v62 = vmul.f32 0.5, %v1304_v54  ;;  %v547_v22 = vadd.f32 1.0, %v1055_v26 }
 0x14a   :  { %v433_v19 = vmul.f32 %v401_v11, %v1418_v23  ;;  %v1432_v25 = vadd.f32 %v305_v6, %v1241_v63  ;;  %v1434_v27 = vpop.eup %1064  ;;  %v494_v28 = vmul.f32 %v462_v3, %v366_v10  ;;  %v432_v30 = vmul.f32 %v400_v58, %v1410_v34 }
 0x14b   :  { %1076 = vtanh.f32 %v495_v12  ;;  %v369_v38 = vmul.f32 0.7978846, %v1418_v23  ;;  %v577_v32 = vmul.f32 %v545_v18, %v321_v16  ;;  %v579_v37 = vmul.f32 %v547_v22, %v323_v62 }
 0x14c   :  { %v465_v48 = vadd.f32 1.0, %v433_v19  ;;  %v434_v59 = vmul.f32 %v402_v13, %v1422_v2  ;;  %v403_v42 = vmul.f32 0.044715, %v1432_v25  ;;  %v320_v54 = vmul.f32 0.5, %v1282_v20 }
 0x14d   :  { %v544_v63 = vadd.f32 1.0, %v1368_v44  ;;  %v1067_v26 = vpop.eup %1066  ;;  %v603_v8 = vpack.c.bf16 %v579_v37, %v577_v32  ;;  %v322_v0 = vmul.f32 0.5, %v1297_v41  ;;  %v546_v17 = vadd.f32 1.0, %v1390_v7 }
 0x14e   :  { %v497_v43 = vmul.f32 %v465_v48, %v369_v38  ;;  %1078 = vtanh.f32 %v494_v28  ;;  %v464_v15 = vadd.f32 1.0, %v432_v30  ;;  %v370_v36 = vmul.f32 0.7978846, %v1422_v2 }
 0x14f   :  { %v435_v46 = vmul.f32 %v403_v42, %v1432_v25  ;;  %803 = vmatprep.mubr.bf16.mxu1 %v603_v8  ;;  %v576_v50 = vmul.f32 %v544_v63, %v320_v54  ;;  %v578_v9 = vmul.f32 %v546_v17, %v322_v0  ;;  %v325_v20 = vmul.f32 0.5, %v1318_v14 }
 0x150   :  { %v549_v52 = vadd.f32 1.0, %v1059_v53  ;;  %v1069_v44 = vpop.eup %1068  ;;  %v371_v45 = vmul.f32 0.7978846, %v1432_v25  ;;  %v327_v41 = vmul.f32 0.5, %v1332_v39  ;;  %v551_v60 = vadd.f32 1.0, %v1063_v21 }
 0x151   :  { %v467_v35 = vadd.f32 1.0, %v435_v46  ;;  %v1071_v7 = vpop.eup %1070  ;;  %1080 = vtanh.f32 %v497_v43  ;;  %v466_v3 = vadd.f32 1.0, %v434_v59  ;;  %v602_v55 = vpack.c.bf16 %v578_v9, %v576_v50 }
 0x152   :  { %v581_v4 = vmul.f32 %v549_v52, %v325_v20  ;;  %v1073_v49 = vpop.eup %1072  ;;  %v583_v6 = vmul.f32 %v551_v60, %v327_v41  ;;  %v326_v10 = vmul.f32 0.5, %v1325_v24  ;;  %v550_v14 = vadd.f32 1.0, %v1414_v56 }
 0x153   :  { %v499_v58 = vmul.f32 %v467_v35, %v371_v45  ;;  %804 = vmatmul.mubr.bf16.gmra.mxu1 %v602_v55  ;;  %v548_v53 = vadd.f32 1.0, %v1402_v40  ;;  %v331_v11 = vmul.f32 0.5, %v1364_v31  ;;  %v553_v12 = vadd.f32 1.0, %v1067_v26 }
 0x154   :  { %v555_v39 = vadd.f32 1.0, %v1069_v44  ;;  %v1075_v21 = vpop.eup %1074  ;;  %v368_v13 = vmul.f32 0.7978846, %v1410_v34  ;;  %v605_v16 = vpack.c.bf16 %v583_v6, %v581_v4  ;;  %v329_v18 = vmul.f32 0.5, %v1348_v61  ;;  %v1470_v6 = vld [vmem:[%s1498_s4] ss:$0 sm:$0xff] }
 0x155   :  { %1082 = vtanh.f32 %v499_v58  ;;  %v498_v19 = vmul.f32 %v466_v3, %v370_v36  ;;  %v324_v62 = vmul.f32 0.5, %v1308_v1  ;;  %v582_v24 = vmul.f32 %v550_v14, %v326_v10  ;;  %s1182_s4 = smov [#allocation8]  }
 0x156   :  { %v587_v22 = vmul.f32 %v555_v39, %v331_v11  ;;  %811 = vmatprep.mubr.bf16.mxu1 %v605_v16  ;;  %v585_v56 = vmul.f32 %v553_v12, %v329_v18  ;;  %v496_v40 = vmul.f32 %v464_v15, %v368_v13  ;;  %v554_v32 = vadd.f32 1.0, %v1071_v7  ;;  %s865_s12 = sshll.u32 %s1182_s4, 4  ;;  %s866_s12 = int_to_ptr.vmem [resolvable:$true] %s865_s12 }
 0x157   :  { %v580_v30 = vmul.f32 %v548_v53, %v324_v62  ;;  %1084 = vtanh.f32 %v498_v19  ;;  %v335_v37 = vmul.f32 0.5, %v1399_v29  ;;  %v557_v59 = vadd.f32 1.0, %v1075_v21  ;;  %s1148_s13 = scalar_lea.vmem %s866_s12, 2048  ;;  %p1153_p2 = scmp.lt.s32.totalorder %s866_s12, %s866_s12 }
 0x158   :  { %v1077_v28 = vpop.eup %1076  ;;  %v607_v31 = vpack.c.bf16 %v587_v22, %v585_v56  ;;  %1086 = vtanh.f32 %v496_v40  ;;  %v330_v1 = vmul.f32 0.5, %v1351_v5  ;;  %v552_v61 = vadd.f32 1.0, %v1434_v27  ;;  %p1149_p1 = scmp.ne.s32.totalorder %s866_s12, %s1148_s13  ;;  %p1154_p3 = scmp.lt.s32.totalorder %s1148_s13, %s1148_s13 }
 0x159   :  { %v559_v38 = vadd.f32 1.0, %v1077_v28  ;;  %v604_v48 = vpack.c.bf16 %v582_v24, %v580_v30  ;;  %v333_v54 = vmul.f32 0.5, %v1380_v33  ;;  %v328_v26 = vmul.f32 0.5, %v1338_v47 }
 0x15a   :  { %v586_v43 = vmul.f32 %v554_v32, %v330_v1  ;;  %v339_v50 = vmul.f32 0.5, %v1432_v25  ;;  %v334_v27 = vmul.f32 0.5, %v1384_v57  ;;  %v556_v20 = vadd.f32 1.0, %v1073_v49  ;;  %p1155_p4 = por %p1154_p3, %p1153_p2 }
 0x15b   :  { %v1079_v42 = vpop.eup %1078  ;;  %812 = vmatmul.mubr.bf16.gmra.mxu1 %v604_v48  ;;  %v591_v63 = vmul.f32 %v559_v38, %v335_v37  ;;  %v589_v0 = vmul.f32 %v557_v59, %v333_v54  ;;  %v584_v17 = vmul.f32 %v552_v61, %v328_v26  ;;  %v337_v33 = vmul.f32 0.5, %v1418_v23 }
 0x15c   :  { %819 = vmatprep.mubr.bf16.mxu1 %v607_v31  ;;  %v558_v46 = vadd.f32 1.0, %v1079_v42  ;;  %v332_v52 = vmul.f32 0.5, %v1375_v51  ;;  %v338_v55 = vmul.f32 0.5, %v1422_v2  ;;  %v336_v57 = vmul.f32 0.5, %v1410_v34  ;;  %p1156_p5 = pnand %p1155_p4, %p1149_p1 }
 0x15d   :  { %v609_v15 = vpack.c.bf16 %v591_v63, %v589_v0  ;;  %v606_v36 = vpack.c.bf16 %v586_v43, %v584_v17 }
 0x15e   :  { %v1081_v8 = vpop.eup %1080  ;;  %v590_v44 = vmul.f32 %v558_v46, %v334_v27  ;;  %v588_v41 = vmul.f32 %v556_v20, %v332_v52 }
 0x15f   :  { %v561_v9 = vadd.f32 1.0, %v1081_v8 }
 0x160   :  { %v608_v3 = vpack.c.bf16 %v590_v44, %v588_v41 }
 0x161   :  { %v593_v35 = vmul.f32 %v561_v9, %v337_v33 }
 0x162   :  { %v1083_v29 = vpop.eup %1082 }
 0x163   :  { %v563_v5 = vadd.f32 1.0, %v1083_v29  ;;  %820 = vmatmul.mubr.bf16.gmra.mxu1 %v606_v36 }
 0x164   :  { %827 = vmatprep.mubr.bf16.mxu1 %v609_v15  ;;  %v1085_v45 = vpop.eup %1084 }
 0x165   :  { %v595_v47 = vmul.f32 %v563_v5, %v339_v50  ;;  %v1087_v60 = vpop.eup %1086  ;;  %v562_v25 = vadd.f32 1.0, %v1085_v45 }
 0x166   :  { %v560_v4 = vadd.f32 1.0, %v1087_v60 }
 0x167   :  { %v611_v7 = vpack.c.bf16 %v595_v47, %v593_v35  ;;  %v594_v49 = vmul.f32 %v562_v25, %v338_v55 }
 0x168   :  { %v592_v23 = vmul.f32 %v560_v4, %v336_v57 }
 0x16a   :  { %v610_v58 = vpack.c.bf16 %v594_v49, %v592_v23 }
 0x16b   :  { %828 = vmatmul.mubr.bf16.gmra.mxu1 %v608_v3 }
 0x16c   :  { %835 = vmatprep.mubr.bf16.mxu1 %v611_v7 }
 0x173   :  { %836 = vmatmul.mubr.bf16.gmra.mxu1 %v610_v58 }
 0x1f1   :  { %v927_v51 = vpop.f32.mrf.mxu1 }
 0x1f3   :  { %v928_v10 = vpop.f32.mrf.mxu1 }
 0x1f4   :  { %v929_v14 = vadd.f32 %v928_v10, %v927_v51 }
 0x1f5   :  { %v930_v53 = vpop.f32.mrf.mxu1 }
 0x1f6   :  { %v782_v11 = vadd.f32 %v929_v14, %v1470_v6 }
 0x1f7   :  { %v931_v2 = vpop.f32.mrf.mxu1 }
 0x1f8   :  { %844 = vst [vmem:[#allocation8] sm:$0xff] %v782_v11  ;;  %v932_v12 = vadd.f32 %v931_v2, %v930_v53 }
 0x1fa   :  { %v785_v34 = vadd.f32 %v932_v12, %v1470_v6 }
 0x1fc   :  { %845 = vst [vmem:[#allocation8 + $0x8] sm:$0xff] %v785_v34 }
 0x1fe   :  { %v933_v39 = vpop.f32.mrf.mxu1 }
 0x200   :  { %v934_v21 = vpop.f32.mrf.mxu1 }
 0x201   :  { %v935_v13 = vadd.f32 %v934_v21, %v933_v39 }
 0x202   :  { %v936_v16 = vpop.f32.mrf.mxu1 }
 0x203   :  { %v790_v18 = vadd.f32 %v935_v13, %v1470_v6 }
 0x204   :  { %v937_v19 = vpop.f32.mrf.mxu1 }
 0x205   :  { %846 = vst [vmem:[#allocation8 + $0x10] sm:$0xff] %v790_v18  ;;  %v938_v62 = vadd.f32 %v937_v19, %v936_v16 }
 0x207   :  { %v793_v24 = vadd.f32 %v938_v62, %v1470_v6 }
 0x209   :  { %847 = vst [vmem:[#allocation8 + $0x18] sm:$0xff] %v793_v24  ;;  %v939_v22 = vpop.f32.mrf.mxu1 }
 0x20b   :  { %v940_v56 = vpop.f32.mrf.mxu1 }
 0x20c   :  { %v941_v28 = vadd.f32 %v940_v56, %v939_v22 }
 0x20d   :  { %v942_v40 = vpop.f32.mrf.mxu1 }
 0x20e   :  { %v798_v30 = vadd.f32 %v941_v28, %v1470_v6 }
 0x20f   :  { %v943_v31 = vpop.f32.mrf.mxu1 }
 0x210   :  { %848 = vst [vmem:[#allocation8 + $0x20] sm:$0xff] %v798_v30  ;;  %v944_v38 = vadd.f32 %v943_v31, %v942_v40 }
 0x212   :  { %v801_v48 = vadd.f32 %v944_v38, %v1470_v6 }
 0x213   :  { %v945_v32 = vpop.f32.mrf.mxu1 }
 0x214   :  { %849 = vst [vmem:[#allocation8 + $0x28] sm:$0xff] %v801_v48 }
 0x215   :  { %v946_v37 = vpop.f32.mrf.mxu1 }
 0x216   :  { %v947_v59 = vadd.f32 %v946_v37, %v945_v32 }
 0x217   :  { %v948_v42 = vpop.f32.mrf.mxu1 }
 0x218   :  { %v806_v1 = vadd.f32 %v947_v59, %v1470_v6 }
 0x219   :  { %v949_v61 = vpop.f32.mrf.mxu1 }
 0x21a   :  { %850 = vst [vmem:[#allocation8 + $0x30] sm:$0xff] %v806_v1  ;;  %v950_v54 = vadd.f32 %v949_v61, %v948_v42 }
 0x21b   :  { %v951_v63 = vpop.f32.mrf.mxu1 }
 0x21c   :  { %v809_v26 = vadd.f32 %v950_v54, %v1470_v6 }
 0x21d   :  { %v952_v43 = vpop.f32.mrf.mxu1 }
 0x21e   :  { %851 = vst [vmem:[#allocation8 + $0x38] sm:$0xff] %v809_v26  ;;  %v953_v8 = vadd.f32 %v952_v43, %v951_v63 }
 0x21f   :  { %v954_v0 = vpop.f32.mrf.mxu1 }
 0x220   :  { %v814_v17 = vadd.f32 %v953_v8, %v1470_v6 }
 0x221   :  { %v955_v15 = vpop.f32.mrf.mxu1 }
 0x222   :  { %852 = vst [vmem:[#allocation8 + $0x40] sm:$0xff] %v814_v17  ;;  %v956_v29 = vadd.f32 %v955_v15, %v954_v0 }
 0x223   :  { %v957_v36 = vpop.f32.mrf.mxu1 }
 0x224   :  { %v817_v46 = vadd.f32 %v956_v29, %v1470_v6 }
 0x225   :  { %v958_v50 = vpop.f32.mrf.mxu1 }
 0x226   :  { %853 = vst [vmem:[#allocation8 + $0x48] sm:$0xff] %v817_v46  ;;  %v959_v9 = vadd.f32 %v958_v50, %v957_v36 }
 0x227   :  { %v960_v5 = vpop.f32.mrf.mxu1 }
 0x228   :  { %v822_v27 = vadd.f32 %v959_v9, %v1470_v6 }
 0x229   :  { %v961_v20 = vpop.f32.mrf.mxu1 }
 0x22a   :  { %854 = vst [vmem:[#allocation8 + $0x50] sm:$0xff] %v822_v27  ;;  %v962_v33 = vadd.f32 %v961_v20, %v960_v5 }
 0x22b   :  { %v963_v47 = vpop.f32.mrf.mxu1 }
 0x22c   :  { %v825_v52 = vadd.f32 %v962_v33, %v1470_v6 }
 0x22d   :  { %v964_v44 = vpop.f32.mrf.mxu1 }
 0x22e   :  { %855 = vst [vmem:[#allocation8 + $0x58] sm:$0xff] %v825_v52  ;;  %v965_v45 = vadd.f32 %v964_v44, %v963_v47 }
 0x22f   :  { %v966_v35 = vpop.f32.mrf.mxu1 }
 0x230   :  { %v830_v41 = vadd.f32 %v965_v45, %v1470_v6 }
 0x231   :  { %v967_v60 = vpop.f32.mrf.mxu1 }
 0x232   :  { %856 = vst [vmem:[#allocation8 + $0x60] sm:$0xff] %v830_v41  ;;  %v968_v7 = vadd.f32 %v967_v60, %v966_v35 }
 0x233   :  { %v969_v3 = vpop.f32.mrf.mxu1 }
 0x234   :  { %v833_v25 = vadd.f32 %v968_v7, %v1470_v6 }
 0x235   :  { %v970_v55 = vpop.f32.mrf.mxu1 }
 0x236   :  { %857 = vst [vmem:[#allocation8 + $0x68] sm:$0xff] %v833_v25  ;;  %v971_v4 = vadd.f32 %v970_v55, %v969_v3 }
 0x237   :  { %v972_v57 = vpop.f32.mrf.mxu1 }
 0x238   :  { %v838_v49 = vadd.f32 %v971_v4, %v1470_v6 }
 0x239   :  { %v973_v23 = vpop.f32.mrf.mxu1 }
 0x23a   :  { %858 = vst [vmem:[#allocation8 + $0x70] sm:$0xff] %v838_v49  ;;  %v974_v58 = vadd.f32 %v973_v23, %v972_v57 }
 0x23c   :  { %v841_v51 = vadd.f32 %v974_v58, %v1470_v6 }
 0x23e   :  { %859 = vst [vmem:[#allocation8 + $0x78] sm:$0xff] %v841_v51 }
 0x23f   :  { %1159 = shalt.err (!%p1156_p5)
}
 0x240   :  { %871 = dma.vmem_to_hbm [thread:$0]  %s866_s12, 2048, %s1499_s5, [#allocation4], %s1176_s23, %s1176_s23, %s1177_s24  }
 0x241   :  { %1172 = dma.done.wait [#allocation4], 2048  }
 0x242   :  { %1173 = vsyncadd [#allocation4], 4294965248 }
 0x243   :  { %875 = vsyncpa [#allocation3], 1 }
 0x244   :  { %876 = vsyncpa [#allocation6], 1 }
 0x245   :  { %877 = vsyncpa [#allocation4], 1 }

</bundles_post_ra>
